<compile_context>
chip_gen: v5e
topology: v5e:2x2
jax: 0.10.0
libtpu: 0.0.40
codegen_flags: <defaults>
</compile_context>

<pallas_src>
from functools import partial

import jax
import jax.numpy as jnp
from jax.experimental import pallas as pl
from jax.experimental.pallas import tpu as pltpu  # noqa: F401  (TPU backend)

NUM_HEADS = 4


# ------------------------- in-kernel building blocks ------------------------ #

def _layernorm(x, g, b):
    # f32 elementwise math (v5e-safe: no bf16 VPU/EUP there).
    mu = jnp.mean(x, axis=-1, keepdims=True)
    var = jnp.mean((x - mu) ** 2, axis=-1, keepdims=True)
    return (x - mu) * jax.lax.rsqrt(var + 1e-5) * g + b


def _attention(q_flat, kv_flat, bias, w, vec, *, B, Lq, Lk, num_heads):
    """Fused LayerNorm(q), LayerNorm(kv), multi-head attention (register-level).

    q_flat:  (B*Lq, D) f32    kv_flat: (B*Lk, D) f32
    bias:    (B, 1, Lk) f32 additive, or None
    w:       (D, 4D) bf16 packed [Wq | Wk | Wv | Wo]
    vec:     (8, D) f32 packed [q_ln_g, q_ln_b, kv_ln_g, kv_ln_b, bq, bk, bv, bo]
    returns: (B*Lq, D) f32
    """
    D = q_flat.shape[-1]
    hd = D // num_heads
    scale = 1.0 / float(hd) ** 0.5

    wq = w[:, 0 * D:1 * D]
    wkv = w[:, 1 * D:3 * D]          # fused K|V projection, N = 2D = 256 lanes
    wo = w[:, 3 * D:4 * D]

    qn = _layernorm(q_flat, vec[0:1, :], vec[1:2, :])
    kn = _layernorm(kv_flat, vec[2:3, :], vec[3:4, :])

    # Fold the softmax scale into the (small) normalized queries, not the scores.
    qn = (qn * scale).astype(jnp.bfloat16)
    kn = kn.astype(jnp.bfloat16)

    # Batch-folded full-width projections: bf16 MXU operands, f32 accumulation.
    qp = jnp.dot(qn, wq, preferred_element_type=jnp.float32) + vec[4:5, :]
    kvp = jnp.dot(kn, wkv, preferred_element_type=jnp.float32)
    kp = kvp[:, :D] + vec[5:6, :]
    vp = kvp[:, D:] + vec[6:7, :]

    qp = qp.astype(jnp.bfloat16)
    kp = kp.astype(jnp.bfloat16)
    vp = vp.astype(jnp.bfloat16)

    # Head split in registers (static sublane/lane slices; no VMEM scratch,
    # no masked vst.msk partial stores).
    def split(x, L):
        return jnp.stack(
            [x[b * L:(b + 1) * L, h * hd:(h + 1) * hd]
             for b in range(B) for h in range(num_heads)], axis=0)   # (B*H, L, hd)

    qh = split(qp, Lq)
    kh = split(kp, Lk)
    vh = split(vp, Lk)

    # One batched contraction for all (batch, head) pairs.
    s = jnp.einsum('nqd,nkd->nqk', qh, kh,
                   preferred_element_type=jnp.float32)               # (B*H, Lq, Lk)
    if bias is not None:
        bias_n = jnp.concatenate(
            [bias[b:b + 1] for b in range(B) for _ in range(num_heads)],
            axis=0)                                                  # (B*H, 1, Lk)
        s = s + bias_n
    s = s - jnp.max(s, axis=-1, keepdims=True)
    p = jnp.exp(s)
    denom = jnp.maximum(jnp.sum(p, axis=-1, keepdims=True), 1e-20)   # NaN guard
    p = p * pl.reciprocal(denom, approx=True)                        # EUP slot

    ctx = jnp.einsum('nqk,nkd->nqd', p.astype(jnp.bfloat16), vh,
                     preferred_element_type=jnp.float32)             # (B*H, Lq, hd)

    # Merge heads back to (B*Lq, D) in registers, then one output projection.
    ctx_flat = jnp.concatenate(
        [jnp.concatenate([ctx[b * num_heads + h] for h in range(num_heads)],
                         axis=-1)
         for b in range(B)], axis=0)                                 # (B*Lq, D)
    out = jnp.dot(ctx_flat.astype(jnp.bfloat16), wo,
                  preferred_element_type=jnp.float32) + vec[7:8, :]
    return out


# ------------------------------ fused kernel ------------------------------- #

def _fused_forward_kernel(*refs, B, n_patch, L, D, num_heads, with_local):
    if with_local:
        (x_patch_ref, pos_img_ref, cls_img_ref, tok_ref, txt_bias_ref,
         w_pe_ref, b_pe_ref, w_attn_ref, vec_attn_ref, cls_local_ref,
         vl_ref, local_ref) = refs
    else:
        (x_patch_ref, pos_img_ref, cls_img_ref, tok_ref, txt_bias_ref,
         w_pe_ref, b_pe_ref, w_attn_ref, vec_attn_ref,
         vl_ref) = refs

    Li = 1 + n_patch

    # visual_encoder: patch-embed matmul + positional embedding + CLS token.
    pe = (jnp.dot(x_patch_ref[...].astype(jnp.bfloat16), w_pe_ref[...],
                  preferred_element_type=jnp.float32)
          + b_pe_ref[...])                                           # (B*n_patch, D)
    img_rows = []
    for b in range(B):
        pb = pe[b * n_patch:(b + 1) * n_patch, :] + pos_img_ref[...]
        img_rows.append(jnp.concatenate([cls_img_ref[...], pb], axis=0))
    image_flat = jnp.concatenate(img_rows, axis=0)                   # (B*Li, D)

    tok = tok_ref[...]                                               # (B*L, D)
    txt_bias = txt_bias_ref[...]                                     # (B, 1, L)

    # text_encoder.bert (mode='text'): one fused LN + self-attention layer.
    text_flat = _attention(tok, tok, txt_bias,
                           w_attn_ref[0], vec_attn_ref[0],
                           B=B, Lq=L, Lk=L, num_heads=num_heads)     # (B*L, D)

    # fusion (mode='fusion'): text queries attend to image keys/values.
    # image_atts are all-ones -> no additive bias over image keys.
    fused_flat = _attention(text_flat, image_flat, None,
                            w_attn_ref[1], vec_attn_ref[1],
                            B=B, Lq=L, Lk=Li, num_heads=num_heads)   # (B*L, D)

    # Fusion CLS token per batch element -> lane-dense (B, D) output.
    vl_ref[...] = jnp.concatenate(
        [fused_flat[b * L:b * L + 1, :] for b in range(B)], axis=0)

    if with_local:
        # it_cross_attn: image queries over text keys, text key-padding mask.
        it_flat = _attention(image_flat, text_flat, txt_bias,
                             w_attn_ref[2], vec_attn_ref[2],
                             B=B, Lq=Li, Lk=L, num_heads=num_heads)
        # aggregator: local CLS query over the (non-CLS) patch features.
        kv_local = jnp.concatenate(
            [it_flat[b * Li + 1:(b + 1) * Li, :] for b in range(B)], axis=0)
        q_local = jnp.concatenate([cls_local_ref[...] for _ in range(B)], axis=0)
        aggr_flat = _attention(q_local, kv_local, None,
                               w_attn_ref[3], vec_attn_ref[3],
                               B=B, Lq=1, Lk=n_patch, num_heads=num_heads)
        local_ref[...] = aggr_flat                                   # (B, D)


def fused_forward(x_patch, pos_img, cls_img, tok_flat, txt_bias,
                  w_pe, b_pe, w_attn, vec_attn, cls_local=None, *,
                  B, n_patch, L, D, num_heads=NUM_HEADS, with_local=False):
    """Single pallas_call running the whole forward; everything fits in VMEM
    at these shapes, so no grid / no BlockSpec tiling (full-array blocks)."""
    kernel = partial(_fused_forward_kernel, B=B, n_patch=n_patch, L=L, D=D,
                     num_heads=num_heads, with_local=with_local)
    args = [x_patch, pos_img, cls_img, tok_flat, txt_bias, w_pe, b_pe,
            w_attn, vec_attn]
    if with_local:
        args.append(cls_local)
        out_shape = (jax.ShapeDtypeStruct((B, D), jnp.float32),
                     jax.ShapeDtypeStruct((B, D), jnp.float32))
    else:
        out_shape = jax.ShapeDtypeStruct((B, D), jnp.float32)
    return pl.pallas_call(kernel, out_shape=out_shape)(*args)


# --------------------------- parameter construction ------------------------ #

def _pack_attn_params(key, d, scale=0.02):
    ks = jax.random.split(key, 4)
    wq = jax.random.normal(ks[0], (d, d), jnp.float32) * scale
    wk = jax.random.normal(ks[1], (d, d), jnp.float32) * scale
    wv = jax.random.normal(ks[2], (d, d), jnp.float32) * scale
    wo = jax.random.normal(ks[3], (d, d), jnp.float32) * scale
    w_pack = jnp.concatenate([wq, wk, wv, wo], axis=1).astype(jnp.bfloat16)
    ln_g = jnp.ones((d,), jnp.float32)
    ln_b = jnp.zeros((d,), jnp.float32)
    zero = jnp.zeros((d,), jnp.float32)
    # rows: [q_ln_g, q_ln_b, kv_ln_g, kv_ln_b, bq, bk, bv, bo]
    # (query/key LN params kept separate; it_cross_attn & aggregator share the
    #  same values across streams, matching the reference's single norm layer)
    vec_pack = jnp.stack([ln_g, ln_b, ln_g, ln_b, zero, zero, zero, zero], axis=0)
    return w_pack, vec_pack


def init_params(key, *, C, P, D, L, n_patch, vocab, n_layers=4):
    ks = jax.random.split(key, 7 + n_layers)
    cpp = C * P * P
    w_pe = (jax.random.normal(ks[0], (cpp, D), jnp.float32) * 0.02).astype(jnp.bfloat16)
    params = dict(
        w_pe=w_pe,
        b_pe=jnp.zeros((1, D), jnp.float32),
        pos_img=jax.random.normal(ks[1], (n_patch, D), jnp.float32) * 0.02,
        cls_img=jax.random.normal(ks[2], (1, D), jnp.float32) * 0.02,
        tok_emb=jax.random.normal(ks[3], (vocab, D), jnp.float32) * 0.02,
        pos_txt=jax.random.normal(ks[4], (1, L, D), jnp.float32) * 0.02,
        cls_local=jax.random.normal(ks[5], (1, D), jnp.float32) * 0.02,
    )
    w_list, v_list = [], []
    for i in range(n_layers):                     # 0=txt_sa 1=fusion 2=itca 3=aggr
        w, v = _pack_attn_params(ks[7 + i], D)
        w_list.append(w)
        v_list.append(v)
    params['w_attn'] = jnp.stack(w_list, axis=0)       # (n_layers, D, 4D) bf16
    params['vec_attn'] = jnp.stack(v_list, axis=0)     # (n_layers, 8, D) f32
    params['w_itm'] = jax.random.normal(ks[6], (D, 2), jnp.float32) * 0.02
    params['b_itm'] = jnp.zeros((2,), jnp.float32)
    return params


# --------------------------------- forward --------------------------------- #

def visual_model_forward(params, image, input_ids, attention_mask, *,
                         patch_size, with_local_branch=False):
    B, C, Hi, Wi = image.shape
    P = patch_size
    D = params['w_pe'].shape[1]
    L = input_ids.shape[1]
    n_patch = (Hi // P) * (Wi // P)

    # Patchify: pure layout glue (the patch-embed matmul runs inside the kernel).
    x = image.reshape(B, C, Hi // P, P, Wi // P, P)
    x = x.transpose(0, 2, 4, 1, 3, 5).reshape(B * n_patch, C * P * P)

    # Token + position embedding (gather stays in XLA glue), flattened rows.
    tok = (params['tok_emb'][input_ids] + params['pos_txt']).reshape(B * L, D)

    txt_bias = jnp.where(attention_mask == 0, -1e9, 0.0).astype(jnp.float32)
    txt_bias = txt_bias.reshape(B, 1, L)

    # Only DMA the attention layers actually used by this branch.
    n_used = 4 if with_local_branch else 2
    outs = fused_forward(
        x, params['pos_img'], params['cls_img'], tok, txt_bias,
        params['w_pe'], params['b_pe'],
        params['w_attn'][:n_used], params['vec_attn'][:n_used],
        params['cls_local'] if with_local_branch else None,
        B=B, n_patch=n_patch, L=L, D=D, with_local=with_local_branch)

    if with_local_branch:
        vl_cls, local_aggr = outs
    else:
        vl_cls = outs

    # TODO(synk): `vl_embeddings` is undefined in the reference source; use the
    # fusion CLS token (standard ALBEF ITM convention).  The (D -> 2) ITM head
    # is tiny and non-lane-dense, so it runs in plain XLA.
    vl_output = jnp.dot(vl_cls, params['w_itm']) + params['b_itm']
    if with_local_branch:
        return vl_output, local_aggr
    return vl_output


# ----------------------------------- main ----------------------------------- #

if __name__ == "__main__":
    key = jax.random.PRNGKey(0)
    k_param, k_img, k_ids = jax.random.split(key, 3)

    # Lane-dense hidden dim (multiple of 128).
    B, C, Hi, Wi = 2, 4, 16, 16
    P, D, L, vocab = 4, 128, 8, 100
    n_patch = (Hi // P) * (Wi // P)

    params = init_params(k_param, C=C, P=P, D=D, L=L, n_patch=n_patch, vocab=vocab)

    image = jax.random.normal(k_img, (B, C, Hi, Wi), jnp.float32)
    input_ids = jax.random.randint(k_ids, (B, L), 0, vocab, dtype=jnp.int32)
    attention_mask = jnp.array([[1, 1, 1, 1, 1, 1, 1, 1],
                                [1, 1, 1, 1, 1, 0, 0, 0]], dtype=jnp.int32)

    forward = jax.jit(partial(visual_model_forward,
                              patch_size=P, with_local_branch=False))
    vl_output = forward(params, image, input_ids, attention_mask)
    jax.block_until_ready(vl_output)
    assert vl_output.shape == (B, 2) and vl_output.dtype == jnp.float32
    print("KERNEL_OK")
</pallas_src>

<mosaic_0001>
module attributes {stable_mosaic.version = 11 : i64} {
  func.func @_fused_forward_kernel(%arg0: memref<32x64xf32, #tpu.memory_space<vmem>>, %arg1: memref<16x128xf32, #tpu.memory_space<vmem>>, %arg2: memref<1x128xf32, #tpu.memory_space<vmem>>, %arg3: memref<16x128xf32, #tpu.memory_space<vmem>>, %arg4: memref<2x1x8xf32, #tpu.memory_space<vmem>>, %arg5: memref<64x128xbf16, #tpu.memory_space<vmem>>, %arg6: memref<1x128xf32, #tpu.memory_space<vmem>>, %arg7: memref<2x128x512xbf16, #tpu.memory_space<vmem>>, %arg8: memref<2x8x128xf32, #tpu.memory_space<vmem>>, %arg9: memref<2x128xf32, #tpu.memory_space<vmem>>) attributes {dimension_semantics = [], scalar_prefetch = 0 : i64, scratch_operands = 0 : i64, tpu.core_type = #tpu.core_type<tc>} {
    %c0 = arith.constant 0 : index
    %c0_0 = arith.constant 0 : index
    %0 = vector.load %arg0[%c0, %c0_0] : memref<32x64xf32, #tpu.memory_space<vmem>>, vector<32x64xf32>
    %1 = arith.truncf %0 : vector<32x64xf32> to vector<32x64xbf16>
    %c0_1 = arith.constant 0 : index
    %c0_2 = arith.constant 0 : index
    %2 = vector.load %arg5[%c0_1, %c0_2] : memref<64x128xbf16, #tpu.memory_space<vmem>>, vector<64x128xbf16>
    %cst = arith.constant dense<0.000000e+00> : vector<32x128xf32>
    %3 = tpu.matmul %1, %2, %cst {dimension_numbers = #tpu.dot_dimension_numbers<[1], [0], [0], [1], [0, 0, 1, 1], [], []>} : vector<32x64xbf16>, vector<64x128xbf16>, vector<32x128xf32> -> vector<32x128xf32>
    %c0_3 = arith.constant 0 : index
    %c0_4 = arith.constant 0 : index
    %4 = vector.load %arg6[%c0_3, %c0_4] : memref<1x128xf32, #tpu.memory_space<vmem>>, vector<1x128xf32>
    %5 = vector.broadcast %4 : vector<1x128xf32> to vector<32x128xf32>
    %6 = arith.addf %3, %5 : vector<32x128xf32>
    %7 = vector.extract_strided_slice %6 {offsets = [0, 0], sizes = [16, 128], strides = [1, 1]} : vector<32x128xf32> to vector<16x128xf32>
    %c0_5 = arith.constant 0 : index
    %c0_6 = arith.constant 0 : index
    %8 = vector.load %arg1[%c0_5, %c0_6] : memref<16x128xf32, #tpu.memory_space<vmem>>, vector<16x128xf32>
    %9 = arith.addf %7, %8 : vector<16x128xf32>
    %c0_7 = arith.constant 0 : index
    %c0_8 = arith.constant 0 : index
    %10 = vector.load %arg2[%c0_7, %c0_8] : memref<1x128xf32, #tpu.memory_space<vmem>>, vector<1x128xf32>
    %11 = tpu.concatenate %10, %9 in 0 : vector<1x128xf32>, vector<16x128xf32> -> vector<17x128xf32>
    %12 = vector.extract_strided_slice %6 {offsets = [16, 0], sizes = [16, 128], strides = [1, 1]} : vector<32x128xf32> to vector<16x128xf32>
    %c0_9 = arith.constant 0 : index
    %c0_10 = arith.constant 0 : index
    %13 = vector.load %arg1[%c0_9, %c0_10] : memref<16x128xf32, #tpu.memory_space<vmem>>, vector<16x128xf32>
    %14 = arith.addf %12, %13 : vector<16x128xf32>
    %c0_11 = arith.constant 0 : index
    %c0_12 = arith.constant 0 : index
    %15 = vector.load %arg2[%c0_11, %c0_12] : memref<1x128xf32, #tpu.memory_space<vmem>>, vector<1x128xf32>
    %16 = tpu.concatenate %15, %14 in 0 : vector<1x128xf32>, vector<16x128xf32> -> vector<17x128xf32>
    %17 = tpu.concatenate %11, %16 in 0 : vector<17x128xf32>, vector<17x128xf32> -> vector<34x128xf32>
    %c0_13 = arith.constant 0 : index
    %c0_14 = arith.constant 0 : index
    %18 = vector.load %arg3[%c0_13, %c0_14] : memref<16x128xf32, #tpu.memory_space<vmem>>, vector<16x128xf32>
    %c0_15 = arith.constant 0 : index
    %c0_16 = arith.constant 0 : index
    %c0_17 = arith.constant 0 : index
    %19 = vector.load %arg4[%c0_15, %c0_16, %c0_17] : memref<2x1x8xf32, #tpu.memory_space<vmem>>, vector<2x1x8xf32>
    %c0_18 = arith.constant 0 : index
    %c0_19 = arith.constant 0 : index
    %c0_20 = arith.constant 0 : index
    %20 = vector.load %arg7[%c0_18, %c0_19, %c0_20] : memref<2x128x512xbf16, #tpu.memory_space<vmem>>, vector<1x128x512xbf16>
    %21 = vector.shape_cast %20 : vector<1x128x512xbf16> to vector<128x512xbf16>
    %c0_21 = arith.constant 0 : index
    %c0_22 = arith.constant 0 : index
    %c0_23 = arith.constant 0 : index
    %22 = vector.load %arg8[%c0_21, %c0_22, %c0_23] : memref<2x8x128xf32, #tpu.memory_space<vmem>>, vector<1x8x128xf32>
    %23 = vector.shape_cast %22 : vector<1x8x128xf32> to vector<8x128xf32>
    %24 = vector.extract_strided_slice %21 {offsets = [0, 0], sizes = [128, 128], strides = [1, 1]} : vector<128x512xbf16> to vector<128x128xbf16>
    %25 = vector.extract_strided_slice %21 {offsets = [0, 128], sizes = [128, 256], strides = [1, 1]} : vector<128x512xbf16> to vector<128x256xbf16>
    %26 = vector.extract_strided_slice %21 {offsets = [0, 384], sizes = [128, 128], strides = [1, 1]} : vector<128x512xbf16> to vector<128x128xbf16>
    %27 = vector.extract_strided_slice %23 {offsets = [0, 0], sizes = [1, 128], strides = [1, 1]} : vector<8x128xf32> to vector<1x128xf32>
    %28 = vector.extract_strided_slice %23 {offsets = [1, 0], sizes = [1, 128], strides = [1, 1]} : vector<8x128xf32> to vector<1x128xf32>
    %cst_24 = arith.constant dense<0.000000e+00> : vector<16xf32>
    %29 = vector.multi_reduction <add>, %18, %cst_24 [1] : vector<16x128xf32> to vector<16xf32>
    %30 = vector.shape_cast %29 : vector<16xf32> to vector<16x1xf32>
    %cst_25 = arith.constant 1.280000e+02 : f32
    %31 = vector.broadcast %cst_25 : f32 to vector<16x1xf32>
    %32 = arith.divf %30, %31 : vector<16x1xf32>
    %33 = vector.broadcast %32 : vector<16x1xf32> to vector<16x128xf32>
    %34 = arith.subf %18, %33 : vector<16x128xf32>
    %35 = arith.mulf %34, %34 : vector<16x128xf32>
    %cst_26 = arith.constant dense<0.000000e+00> : vector<16xf32>
    %36 = vector.multi_reduction <add>, %35, %cst_26 [1] : vector<16x128xf32> to vector<16xf32>
    %37 = vector.shape_cast %36 : vector<16xf32> to vector<16x1xf32>
    %cst_27 = arith.constant 1.280000e+02 : f32
    %38 = vector.broadcast %cst_27 : f32 to vector<16x1xf32>
    %39 = arith.divf %37, %38 : vector<16x1xf32>
    %40 = vector.broadcast %32 : vector<16x1xf32> to vector<16x128xf32>
    %41 = arith.subf %18, %40 : vector<16x128xf32>
    %cst_28 = arith.constant 9.99999974E-6 : f32
    %42 = vector.broadcast %cst_28 : f32 to vector<16x1xf32>
    %43 = arith.addf %39, %42 : vector<16x1xf32>
    %44 = math.rsqrt %43 : vector<16x1xf32>
    %45 = vector.broadcast %44 : vector<16x1xf32> to vector<16x128xf32>
    %46 = arith.mulf %41, %45 : vector<16x128xf32>
    %47 = vector.broadcast %27 : vector<1x128xf32> to vector<16x128xf32>
    %48 = arith.mulf %46, %47 : vector<16x128xf32>
    %49 = vector.broadcast %28 : vector<1x128xf32> to vector<16x128xf32>
    %50 = arith.addf %48, %49 : vector<16x128xf32>
    %51 = vector.extract_strided_slice %23 {offsets = [2, 0], sizes = [1, 128], strides = [1, 1]} : vector<8x128xf32> to vector<1x128xf32>
    %52 = vector.extract_strided_slice %23 {offsets = [3, 0], sizes = [1, 128], strides = [1, 1]} : vector<8x128xf32> to vector<1x128xf32>
    %cst_29 = arith.constant dense<0.000000e+00> : vector<16xf32>
    %53 = vector.multi_reduction <add>, %18, %cst_29 [1] : vector<16x128xf32> to vector<16xf32>
    %54 = vector.shape_cast %53 : vector<16xf32> to vector<16x1xf32>
    %cst_30 = arith.constant 1.280000e+02 : f32
    %55 = vector.broadcast %cst_30 : f32 to vector<16x1xf32>
    %56 = arith.divf %54, %55 : vector<16x1xf32>
    %57 = vector.broadcast %56 : vector<16x1xf32> to vector<16x128xf32>
    %58 = arith.subf %18, %57 : vector<16x128xf32>
    %59 = arith.mulf %58, %58 : vector<16x128xf32>
    %cst_31 = arith.constant dense<0.000000e+00> : vector<16xf32>
    %60 = vector.multi_reduction <add>, %59, %cst_31 [1] : vector<16x128xf32> to vector<16xf32>
    %61 = vector.shape_cast %60 : vector<16xf32> to vector<16x1xf32>
    %cst_32 = arith.constant 1.280000e+02 : f32
    %62 = vector.broadcast %cst_32 : f32 to vector<16x1xf32>
    %63 = arith.divf %61, %62 : vector<16x1xf32>
    %64 = vector.broadcast %56 : vector<16x1xf32> to vector<16x128xf32>
    %65 = arith.subf %18, %64 : vector<16x128xf32>
    %cst_33 = arith.constant 9.99999974E-6 : f32
    %66 = vector.broadcast %cst_33 : f32 to vector<16x1xf32>
    %67 = arith.addf %63, %66 : vector<16x1xf32>
    %68 = math.rsqrt %67 : vector<16x1xf32>
    %69 = vector.broadcast %68 : vector<16x1xf32> to vector<16x128xf32>
    %70 = arith.mulf %65, %69 : vector<16x128xf32>
    %71 = vector.broadcast %51 : vector<1x128xf32> to vector<16x128xf32>
    %72 = arith.mulf %70, %71 : vector<16x128xf32>
    %73 = vector.broadcast %52 : vector<1x128xf32> to vector<16x128xf32>
    %74 = arith.addf %72, %73 : vector<16x128xf32>
    %cst_34 = arith.constant 0.176776692 : f32
    %75 = vector.broadcast %cst_34 : f32 to vector<16x128xf32>
    %76 = arith.mulf %50, %75 : vector<16x128xf32>
    %77 = arith.truncf %76 : vector<16x128xf32> to vector<16x128xbf16>
    %78 = arith.truncf %74 : vector<16x128xf32> to vector<16x128xbf16>
    %cst_35 = arith.constant dense<0.000000e+00> : vector<16x128xf32>
    %79 = tpu.matmul %77, %24, %cst_35 {dimension_numbers = #tpu.dot_dimension_numbers<[1], [0], [0], [1], [0, 0, 1, 1], [], []>} : vector<16x128xbf16>, vector<128x128xbf16>, vector<16x128xf32> -> vector<16x128xf32>
    %80 = vector.extract_strided_slice %23 {offsets = [4, 0], sizes = [1, 128], strides = [1, 1]} : vector<8x128xf32> to vector<1x128xf32>
    %81 = vector.broadcast %80 : vector<1x128xf32> to vector<16x128xf32>
    %82 = arith.addf %79, %81 : vector<16x128xf32>
    %cst_36 = arith.constant dense<0.000000e+00> : vector<16x256xf32>
    %83 = tpu.matmul %78, %25, %cst_36 {dimension_numbers = #tpu.dot_dimension_numbers<[1], [0], [0], [1], [0, 0, 1, 1], [], []>} : vector<16x128xbf16>, vector<128x256xbf16>, vector<16x256xf32> -> vector<16x256xf32>
    %84 = vector.extract_strided_slice %83 {offsets = [0, 0], sizes = [16, 128], strides = [1, 1]} : vector<16x256xf32> to vector<16x128xf32>
    %85 = vector.extract_strided_slice %23 {offsets = [5, 0], sizes = [1, 128], strides = [1, 1]} : vector<8x128xf32> to vector<1x128xf32>
    %86 = vector.broadcast %85 : vector<1x128xf32> to vector<16x128xf32>
    %87 = arith.addf %84, %86 : vector<16x128xf32>
    %88 = vector.extract_strided_slice %83 {offsets = [0, 128], sizes = [16, 128], strides = [1, 1]} : vector<16x256xf32> to vector<16x128xf32>
    %89 = vector.extract_strided_slice %23 {offsets = [6, 0], sizes = [1, 128], strides = [1, 1]} : vector<8x128xf32> to vector<1x128xf32>
    %90 = vector.broadcast %89 : vector<1x128xf32> to vector<16x128xf32>
    %91 = arith.addf %88, %90 : vector<16x128xf32>
    %92 = arith.truncf %82 : vector<16x128xf32> to vector<16x128xbf16>
    %93 = arith.truncf %87 : vector<16x128xf32> to vector<16x128xbf16>
    %94 = arith.truncf %91 : vector<16x128xf32> to vector<16x128xbf16>
    %95 = vector.extract_strided_slice %92 {offsets = [0, 0], sizes = [8, 32], strides = [1, 1]} : vector<16x128xbf16> to vector<8x32xbf16>
    %96 = vector.extract_strided_slice %92 {offsets = [0, 32], sizes = [8, 32], strides = [1, 1]} : vector<16x128xbf16> to vector<8x32xbf16>
    %97 = vector.extract_strided_slice %92 {offsets = [0, 64], sizes = [8, 32], strides = [1, 1]} : vector<16x128xbf16> to vector<8x32xbf16>
    %98 = vector.extract_strided_slice %92 {offsets = [0, 96], sizes = [8, 32], strides = [1, 1]} : vector<16x128xbf16> to vector<8x32xbf16>
    %99 = vector.extract_strided_slice %92 {offsets = [8, 0], sizes = [8, 32], strides = [1, 1]} : vector<16x128xbf16> to vector<8x32xbf16>
    %100 = vector.extract_strided_slice %92 {offsets = [8, 32], sizes = [8, 32], strides = [1, 1]} : vector<16x128xbf16> to vector<8x32xbf16>
    %101 = vector.extract_strided_slice %92 {offsets = [8, 64], sizes = [8, 32], strides = [1, 1]} : vector<16x128xbf16> to vector<8x32xbf16>
    %102 = vector.extract_strided_slice %92 {offsets = [8, 96], sizes = [8, 32], strides = [1, 1]} : vector<16x128xbf16> to vector<8x32xbf16>
    %103 = vector.shape_cast %95 : vector<8x32xbf16> to vector<1x8x32xbf16>
    %104 = vector.shape_cast %96 : vector<8x32xbf16> to vector<1x8x32xbf16>
    %105 = vector.shape_cast %97 : vector<8x32xbf16> to vector<1x8x32xbf16>
    %106 = vector.shape_cast %98 : vector<8x32xbf16> to vector<1x8x32xbf16>
    %107 = vector.shape_cast %99 : vector<8x32xbf16> to vector<1x8x32xbf16>
    %108 = vector.shape_cast %100 : vector<8x32xbf16> to vector<1x8x32xbf16>
    %109 = vector.shape_cast %101 : vector<8x32xbf16> to vector<1x8x32xbf16>
    %110 = vector.shape_cast %102 : vector<8x32xbf16> to vector<1x8x32xbf16>
    %111 = tpu.concatenate %103, %104, %105, %106, %107, %108, %109, %110 in 0 : vector<1x8x32xbf16>, vector<1x8x32xbf16>, vector<1x8x32xbf16>, vector<1x8x32xbf16>, vector<1x8x32xbf16>, vector<1x8x32xbf16>, vector<1x8x32xbf16>, vector<1x8x32xbf16> -> vector<8x8x32xbf16>
    %112 = vector.extract_strided_slice %93 {offsets = [0, 0], sizes = [8, 32], strides = [1, 1]} : vector<16x128xbf16> to vector<8x32xbf16>
    %113 = vector.extract_strided_slice %93 {offsets = [0, 32], sizes = [8, 32], strides = [1, 1]} : vector<16x128xbf16> to vector<8x32xbf16>
    %114 = vector.extract_strided_slice %93 {offsets = [0, 64], sizes = [8, 32], strides = [1, 1]} : vector<16x128xbf16> to vector<8x32xbf16>
    %115 = vector.extract_strided_slice %93 {offsets = [0, 96], sizes = [8, 32], strides = [1, 1]} : vector<16x128xbf16> to vector<8x32xbf16>
    %116 = vector.extract_strided_slice %93 {offsets = [8, 0], sizes = [8, 32], strides = [1, 1]} : vector<16x128xbf16> to vector<8x32xbf16>
    %117 = vector.extract_strided_slice %93 {offsets = [8, 32], sizes = [8, 32], strides = [1, 1]} : vector<16x128xbf16> to vector<8x32xbf16>
    %118 = vector.extract_strided_slice %93 {offsets = [8, 64], sizes = [8, 32], strides = [1, 1]} : vector<16x128xbf16> to vector<8x32xbf16>
    %119 = vector.extract_strided_slice %93 {offsets = [8, 96], sizes = [8, 32], strides = [1, 1]} : vector<16x128xbf16> to vector<8x32xbf16>
    %120 = vector.shape_cast %112 : vector<8x32xbf16> to vector<1x8x32xbf16>
    %121 = vector.shape_cast %113 : vector<8x32xbf16> to vector<1x8x32xbf16>
    %122 = vector.shape_cast %114 : vector<8x32xbf16> to vector<1x8x32xbf16>
    %123 = vector.shape_cast %115 : vector<8x32xbf16> to vector<1x8x32xbf16>
    %124 = vector.shape_cast %116 : vector<8x32xbf16> to vector<1x8x32xbf16>
    %125 = vector.shape_cast %117 : vector<8x32xbf16> to vector<1x8x32xbf16>
    %126 = vector.shape_cast %118 : vector<8x32xbf16> to vector<1x8x32xbf16>
    %127 = vector.shape_cast %119 : vector<8x32xbf16> to vector<1x8x32xbf16>
    %128 = tpu.concatenate %120, %121, %122, %123, %124, %125, %126, %127 in 0 : vector<1x8x32xbf16>, vector<1x8x32xbf16>, vector<1x8x32xbf16>, vector<1x8x32xbf16>, vector<1x8x32xbf16>, vector<1x8x32xbf16>, vector<1x8x32xbf16>, vector<1x8x32xbf16> -> vector<8x8x32xbf16>
    %129 = vector.extract_strided_slice %94 {offsets = [0, 0], sizes = [8, 32], strides = [1, 1]} : vector<16x128xbf16> to vector<8x32xbf16>
    %130 = vector.extract_strided_slice %94 {offsets = [0, 32], sizes = [8, 32], strides = [1, 1]} : vector<16x128xbf16> to vector<8x32xbf16>
    %131 = vector.extract_strided_slice %94 {offsets = [0, 64], sizes = [8, 32], strides = [1, 1]} : vector<16x128xbf16> to vector<8x32xbf16>
    %132 = vector.extract_strided_slice %94 {offsets = [0, 96], sizes = [8, 32], strides = [1, 1]} : vector<16x128xbf16> to vector<8x32xbf16>
    %133 = vector.extract_strided_slice %94 {offsets = [8, 0], sizes = [8, 32], strides = [1, 1]} : vector<16x128xbf16> to vector<8x32xbf16>
    %134 = vector.extract_strided_slice %94 {offsets = [8, 32], sizes = [8, 32], strides = [1, 1]} : vector<16x128xbf16> to vector<8x32xbf16>
    %135 = vector.extract_strided_slice %94 {offsets = [8, 64], sizes = [8, 32], strides = [1, 1]} : vector<16x128xbf16> to vector<8x32xbf16>
    %136 = vector.extract_strided_slice %94 {offsets = [8, 96], sizes = [8, 32], strides = [1, 1]} : vector<16x128xbf16> to vector<8x32xbf16>
    %137 = vector.shape_cast %129 : vector<8x32xbf16> to vector<1x8x32xbf16>
    %138 = vector.shape_cast %130 : vector<8x32xbf16> to vector<1x8x32xbf16>
    %139 = vector.shape_cast %131 : vector<8x32xbf16> to vector<1x8x32xbf16>
    %140 = vector.shape_cast %132 : vector<8x32xbf16> to vector<1x8x32xbf16>
    %141 = vector.shape_cast %133 : vector<8x32xbf16> to vector<1x8x32xbf16>
    %142 = vector.shape_cast %134 : vector<8x32xbf16> to vector<1x8x32xbf16>
    %143 = vector.shape_cast %135 : vector<8x32xbf16> to vector<1x8x32xbf16>
    %144 = vector.shape_cast %136 : vector<8x32xbf16> to vector<1x8x32xbf16>
    %145 = tpu.concatenate %137, %138, %139, %140, %141, %142, %143, %144 in 0 : vector<1x8x32xbf16>, vector<1x8x32xbf16>, vector<1x8x32xbf16>, vector<1x8x32xbf16>, vector<1x8x32xbf16>, vector<1x8x32xbf16>, vector<1x8x32xbf16>, vector<1x8x32xbf16> -> vector<8x8x32xbf16>
    "tpu.trace_start"() <{level = 10 : i32, message = "nqd,nkd->nqk"}> : () -> ()
    %cst_37 = arith.constant dense<0.000000e+00> : vector<8x8x8xf32>
    %146 = tpu.matmul %111, %128, %cst_37 {dimension_numbers = #tpu.dot_dimension_numbers<[2], [2], [1], [1], [0, 0, 0, 1, 1, 1], [0], [0]>} : vector<8x8x32xbf16>, vector<8x8x32xbf16>, vector<8x8x8xf32> -> vector<8x8x8xf32>
    "tpu.trace_stop"() : () -> ()
    %147 = vector.extract_strided_slice %19 {offsets = [0, 0, 0], sizes = [1, 1, 8], strides = [1, 1, 1]} : vector<2x1x8xf32> to vector<1x1x8xf32>
    %148 = vector.extract_strided_slice %19 {offsets = [0, 0, 0], sizes = [1, 1, 8], strides = [1, 1, 1]} : vector<2x1x8xf32> to vector<1x1x8xf32>
    %149 = vector.extract_strided_slice %19 {offsets = [0, 0, 0], sizes = [1, 1, 8], strides = [1, 1, 1]} : vector<2x1x8xf32> to vector<1x1x8xf32>
    %150 = vector.extract_strided_slice %19 {offsets = [0, 0, 0], sizes = [1, 1, 8], strides = [1, 1, 1]} : vector<2x1x8xf32> to vector<1x1x8xf32>
    %151 = vector.extract_strided_slice %19 {offsets = [1, 0, 0], sizes = [1, 1, 8], strides = [1, 1, 1]} : vector<2x1x8xf32> to vector<1x1x8xf32>
    %152 = vector.extract_strided_slice %19 {offsets = [1, 0, 0], sizes = [1, 1, 8], strides = [1, 1, 1]} : vector<2x1x8xf32> to vector<1x1x8xf32>
    %153 = vector.extract_strided_slice %19 {offsets = [1, 0, 0], sizes = [1, 1, 8], strides = [1, 1, 1]} : vector<2x1x8xf32> to vector<1x1x8xf32>
    %154 = vector.extract_strided_slice %19 {offsets = [1, 0, 0], sizes = [1, 1, 8], strides = [1, 1, 1]} : vector<2x1x8xf32> to vector<1x1x8xf32>
    %155 = tpu.concatenate %147, %148, %149, %150, %151, %152, %153, %154 in 0 : vector<1x1x8xf32>, vector<1x1x8xf32>, vector<1x1x8xf32>, vector<1x1x8xf32>, vector<1x1x8xf32>, vector<1x1x8xf32>, vector<1x1x8xf32>, vector<1x1x8xf32> -> vector<8x1x8xf32>
    %156 = vector.broadcast %155 : vector<8x1x8xf32> to vector<8x8x8xf32>
    %157 = arith.addf %146, %156 : vector<8x8x8xf32>
    %cst_38 = arith.constant dense<0xFF800000> : vector<8x8xf32>
    %158 = vector.multi_reduction <maximumf>, %157, %cst_38 [2] : vector<8x8x8xf32> to vector<8x8xf32>
    %159 = vector.shape_cast %158 : vector<8x8xf32> to vector<8x8x1xf32>
    %160 = vector.broadcast %159 : vector<8x8x1xf32> to vector<8x8x8xf32>
    %161 = arith.subf %157, %160 : vector<8x8x8xf32>
    %162 = math.exp %161 : vector<8x8x8xf32>
    %cst_39 = arith.constant dense<0.000000e+00> : vector<8x8xf32>
    %163 = vector.multi_reduction <add>, %162, %cst_39 [2] : vector<8x8x8xf32> to vector<8x8xf32>
    %164 = vector.shape_cast %163 : vector<8x8xf32> to vector<8x8x1xf32>
    %cst_40 = arith.constant 9.99999968E-21 : f32
    %165 = vector.broadcast %cst_40 : f32 to vector<8x8x1xf32>
    %166 = arith.maximumf %164, %165 : vector<8x8x1xf32>
    %167 = tpu.reciprocal %166 {approx = true} : vector<8x8x1xf32> -> vector<8x8x1xf32>
    %168 = vector.broadcast %167 : vector<8x8x1xf32> to vector<8x8x8xf32>
    %169 = arith.mulf %162, %168 : vector<8x8x8xf32>
    %170 = arith.truncf %169 : vector<8x8x8xf32> to vector<8x8x8xbf16>
    "tpu.trace_start"() <{level = 10 : i32, message = "nqk,nkd->nqd"}> : () -> ()
    %cst_41 = arith.constant dense<0.000000e+00> : vector<8x8x32xf32>
    %171 = tpu.matmul %170, %145, %cst_41 {dimension_numbers = #tpu.dot_dimension_numbers<[2], [1], [1], [2], [0, 0, 0, 1, 1, 2], [0], [0]>} : vector<8x8x8xbf16>, vector<8x8x32xbf16>, vector<8x8x32xf32> -> vector<8x8x32xf32>
    "tpu.trace_stop"() : () -> ()
    %172 = vector.extract_strided_slice %171 {offsets = [0, 0, 0], sizes = [1, 8, 32], strides = [1, 1, 1]} : vector<8x8x32xf32> to vector<1x8x32xf32>
    %173 = vector.shape_cast %172 : vector<1x8x32xf32> to vector<8x32xf32>
    %174 = vector.extract_strided_slice %171 {offsets = [1, 0, 0], sizes = [1, 8, 32], strides = [1, 1, 1]} : vector<8x8x32xf32> to vector<1x8x32xf32>
    %175 = vector.shape_cast %174 : vector<1x8x32xf32> to vector<8x32xf32>
    %176 = vector.extract_strided_slice %171 {offsets = [2, 0, 0], sizes = [1, 8, 32], strides = [1, 1, 1]} : vector<8x8x32xf32> to vector<1x8x32xf32>
    %177 = vector.shape_cast %176 : vector<1x8x32xf32> to vector<8x32xf32>
    %178 = vector.extract_strided_slice %171 {offsets = [3, 0, 0], sizes = [1, 8, 32], strides = [1, 1, 1]} : vector<8x8x32xf32> to vector<1x8x32xf32>
    %179 = vector.shape_cast %178 : vector<1x8x32xf32> to vector<8x32xf32>
    %180 = tpu.concatenate %173, %175, %177, %179 in 1 : vector<8x32xf32>, vector<8x32xf32>, vector<8x32xf32>, vector<8x32xf32> -> vector<8x128xf32>
    %181 = vector.extract_strided_slice %171 {offsets = [4, 0, 0], sizes = [1, 8, 32], strides = [1, 1, 1]} : vector<8x8x32xf32> to vector<1x8x32xf32>
    %182 = vector.shape_cast %181 : vector<1x8x32xf32> to vector<8x32xf32>
    %183 = vector.extract_strided_slice %171 {offsets = [5, 0, 0], sizes = [1, 8, 32], strides = [1, 1, 1]} : vector<8x8x32xf32> to vector<1x8x32xf32>
    %184 = vector.shape_cast %183 : vector<1x8x32xf32> to vector<8x32xf32>
    %185 = vector.extract_strided_slice %171 {offsets = [6, 0, 0], sizes = [1, 8, 32], strides = [1, 1, 1]} : vector<8x8x32xf32> to vector<1x8x32xf32>
    %186 = vector.shape_cast %185 : vector<1x8x32xf32> to vector<8x32xf32>
    %187 = vector.extract_strided_slice %171 {offsets = [7, 0, 0], sizes = [1, 8, 32], strides = [1, 1, 1]} : vector<8x8x32xf32> to vector<1x8x32xf32>
    %188 = vector.shape_cast %187 : vector<1x8x32xf32> to vector<8x32xf32>
    %189 = tpu.concatenate %182, %184, %186, %188 in 1 : vector<8x32xf32>, vector<8x32xf32>, vector<8x32xf32>, vector<8x32xf32> -> vector<8x128xf32>
    %190 = tpu.concatenate %180, %189 in 0 : vector<8x128xf32>, vector<8x128xf32> -> vector<16x128xf32>
    %191 = arith.truncf %190 : vector<16x128xf32> to vector<16x128xbf16>
    %cst_42 = arith.constant dense<0.000000e+00> : vector<16x128xf32>
    %192 = tpu.matmul %191, %26, %cst_42 {dimension_numbers = #tpu.dot_dimension_numbers<[1], [0], [0], [1], [0, 0, 1, 1], [], []>} : vector<16x128xbf16>, vector<128x128xbf16>, vector<16x128xf32> -> vector<16x128xf32>
    %193 = vector.extract_strided_slice %23 {offsets = [7, 0], sizes = [1, 128], strides = [1, 1]} : vector<8x128xf32> to vector<1x128xf32>
    %194 = vector.broadcast %193 : vector<1x128xf32> to vector<16x128xf32>
    %195 = arith.addf %192, %194 : vector<16x128xf32>
    %c1 = arith.constant 1 : index
    %c0_43 = arith.constant 0 : index
    %c0_44 = arith.constant 0 : index
    %196 = vector.load %arg7[%c1, %c0_43, %c0_44] : memref<2x128x512xbf16, #tpu.memory_space<vmem>>, vector<1x128x512xbf16>
    %197 = vector.shape_cast %196 : vector<1x128x512xbf16> to vector<128x512xbf16>
    %c1_45 = arith.constant 1 : index
    %c0_46 = arith.constant 0 : index
    %c0_47 = arith.constant 0 : index
    %198 = vector.load %arg8[%c1_45, %c0_46, %c0_47] : memref<2x8x128xf32, #tpu.memory_space<vmem>>, vector<1x8x128xf32>
    %199 = vector.shape_cast %198 : vector<1x8x128xf32> to vector<8x128xf32>
    %200 = vector.extract_strided_slice %197 {offsets = [0, 0], sizes = [128, 128], strides = [1, 1]} : vector<128x512xbf16> to vector<128x128xbf16>
    %201 = vector.extract_strided_slice %197 {offsets = [0, 128], sizes = [128, 256], strides = [1, 1]} : vector<128x512xbf16> to vector<128x256xbf16>
    %202 = vector.extract_strided_slice %197 {offsets = [0, 384], sizes = [128, 128], strides = [1, 1]} : vector<128x512xbf16> to vector<128x128xbf16>
    %203 = vector.extract_strided_slice %199 {offsets = [0, 0], sizes = [1, 128], strides = [1, 1]} : vector<8x128xf32> to vector<1x128xf32>
    %204 = vector.extract_strided_slice %199 {offsets = [1, 0], sizes = [1, 128], strides = [1, 1]} : vector<8x128xf32> to vector<1x128xf32>
    %cst_48 = arith.constant dense<0.000000e+00> : vector<16xf32>
    %205 = vector.multi_reduction <add>, %195, %cst_48 [1] : vector<16x128xf32> to vector<16xf32>
    %206 = vector.shape_cast %205 : vector<16xf32> to vector<16x1xf32>
    %cst_49 = arith.constant 1.280000e+02 : f32
    %207 = vector.broadcast %cst_49 : f32 to vector<16x1xf32>
    %208 = arith.divf %206, %207 : vector<16x1xf32>
    %209 = vector.broadcast %208 : vector<16x1xf32> to vector<16x128xf32>
    %210 = arith.subf %195, %209 : vector<16x128xf32>
    %211 = arith.mulf %210, %210 : vector<16x128xf32>
    %cst_50 = arith.constant dense<0.000000e+00> : vector<16xf32>
    %212 = vector.multi_reduction <add>, %211, %cst_50 [1] : vector<16x128xf32> to vector<16xf32>
    %213 = vector.shape_cast %212 : vector<16xf32> to vector<16x1xf32>
    %cst_51 = arith.constant 1.280000e+02 : f32
    %214 = vector.broadcast %cst_51 : f32 to vector<16x1xf32>
    %215 = arith.divf %213, %214 : vector<16x1xf32>
    %216 = vector.broadcast %208 : vector<16x1xf32> to vector<16x128xf32>
    %217 = arith.subf %195, %216 : vector<16x128xf32>
    %cst_52 = arith.constant 9.99999974E-6 : f32
    %218 = vector.broadcast %cst_52 : f32 to vector<16x1xf32>
    %219 = arith.addf %215, %218 : vector<16x1xf32>
    %220 = math.rsqrt %219 : vector<16x1xf32>
    %221 = vector.broadcast %220 : vector<16x1xf32> to vector<16x128xf32>
    %222 = arith.mulf %217, %221 : vector<16x128xf32>
    %223 = vector.broadcast %203 : vector<1x128xf32> to vector<16x128xf32>
    %224 = arith.mulf %222, %223 : vector<16x128xf32>
    %225 = vector.broadcast %204 : vector<1x128xf32> to vector<16x128xf32>
    %226 = arith.addf %224, %225 : vector<16x128xf32>
    %227 = vector.extract_strided_slice %199 {offsets = [2, 0], sizes = [1, 128], strides = [1, 1]} : vector<8x128xf32> to vector<1x128xf32>
    %228 = vector.extract_strided_slice %199 {offsets = [3, 0], sizes = [1, 128], strides = [1, 1]} : vector<8x128xf32> to vector<1x128xf32>
    %cst_53 = arith.constant dense<0.000000e+00> : vector<34xf32>
    %229 = vector.multi_reduction <add>, %17, %cst_53 [1] : vector<34x128xf32> to vector<34xf32>
    %230 = vector.shape_cast %229 : vector<34xf32> to vector<34x1xf32>
    %cst_54 = arith.constant 1.280000e+02 : f32
    %231 = vector.broadcast %cst_54 : f32 to vector<34x1xf32>
    %232 = arith.divf %230, %231 : vector<34x1xf32>
    %233 = vector.broadcast %232 : vector<34x1xf32> to vector<34x128xf32>
    %234 = arith.subf %17, %233 : vector<34x128xf32>
    %235 = arith.mulf %234, %234 : vector<34x128xf32>
    %cst_55 = arith.constant dense<0.000000e+00> : vector<34xf32>
    %236 = vector.multi_reduction <add>, %235, %cst_55 [1] : vector<34x128xf32> to vector<34xf32>
    %237 = vector.shape_cast %236 : vector<34xf32> to vector<34x1xf32>
    %cst_56 = arith.constant 1.280000e+02 : f32
    %238 = vector.broadcast %cst_56 : f32 to vector<34x1xf32>
    %239 = arith.divf %237, %238 : vector<34x1xf32>
    %240 = vector.broadcast %232 : vector<34x1xf32> to vector<34x128xf32>
    %241 = arith.subf %17, %240 : vector<34x128xf32>
    %cst_57 = arith.constant 9.99999974E-6 : f32
    %242 = vector.broadcast %cst_57 : f32 to vector<34x1xf32>
    %243 = arith.addf %239, %242 : vector<34x1xf32>
    %244 = math.rsqrt %243 : vector<34x1xf32>
    %245 = vector.broadcast %244 : vector<34x1xf32> to vector<34x128xf32>
    %246 = arith.mulf %241, %245 : vector<34x128xf32>
    %247 = vector.broadcast %227 : vector<1x128xf32> to vector<34x128xf32>
    %248 = arith.mulf %246, %247 : vector<34x128xf32>
    %249 = vector.broadcast %228 : vector<1x128xf32> to vector<34x128xf32>
    %250 = arith.addf %248, %249 : vector<34x128xf32>
    %cst_58 = arith.constant 0.176776692 : f32
    %251 = vector.broadcast %cst_58 : f32 to vector<16x128xf32>
    %252 = arith.mulf %226, %251 : vector<16x128xf32>
    %253 = arith.truncf %252 : vector<16x128xf32> to vector<16x128xbf16>
    %254 = arith.truncf %250 : vector<34x128xf32> to vector<34x128xbf16>
    %cst_59 = arith.constant dense<0.000000e+00> : vector<16x128xf32>
    %255 = tpu.matmul %253, %200, %cst_59 {dimension_numbers = #tpu.dot_dimension_numbers<[1], [0], [0], [1], [0, 0, 1, 1], [], []>} : vector<16x128xbf16>, vector<128x128xbf16>, vector<16x128xf32> -> vector<16x128xf32>
    %256 = vector.extract_strided_slice %199 {offsets = [4, 0], sizes = [1, 128], strides = [1, 1]} : vector<8x128xf32> to vector<1x128xf32>
    %257 = vector.broadcast %256 : vector<1x128xf32> to vector<16x128xf32>
    %258 = arith.addf %255, %257 : vector<16x128xf32>
    %cst_60 = arith.constant dense<0.000000e+00> : vector<34x256xf32>
    %259 = tpu.matmul %254, %201, %cst_60 {dimension_numbers = #tpu.dot_dimension_numbers<[1], [0], [0], [1], [0, 0, 1, 1], [], []>} : vector<34x128xbf16>, vector<128x256xbf16>, vector<34x256xf32> -> vector<34x256xf32>
    %260 = vector.extract_strided_slice %259 {offsets = [0, 0], sizes = [34, 128], strides = [1, 1]} : vector<34x256xf32> to vector<34x128xf32>
    %261 = vector.extract_strided_slice %199 {offsets = [5, 0], sizes = [1, 128], strides = [1, 1]} : vector<8x128xf32> to vector<1x128xf32>
    %262 = vector.broadcast %261 : vector<1x128xf32> to vector<34x128xf32>
    %263 = arith.addf %260, %262 : vector<34x128xf32>
    %264 = vector.extract_strided_slice %259 {offsets = [0, 128], sizes = [34, 128], strides = [1, 1]} : vector<34x256xf32> to vector<34x128xf32>
    %265 = vector.extract_strided_slice %199 {offsets = [6, 0], sizes = [1, 128], strides = [1, 1]} : vector<8x128xf32> to vector<1x128xf32>
    %266 = vector.broadcast %265 : vector<1x128xf32> to vector<34x128xf32>
    %267 = arith.addf %264, %266 : vector<34x128xf32>
    %268 = arith.truncf %258 : vector<16x128xf32> to vector<16x128xbf16>
    %269 = arith.truncf %263 : vector<34x128xf32> to vector<34x128xbf16>
    %270 = arith.truncf %267 : vector<34x128xf32> to vector<34x128xbf16>
    %271 = vector.extract_strided_slice %268 {offsets = [0, 0], sizes = [8, 32], strides = [1, 1]} : vector<16x128xbf16> to vector<8x32xbf16>
    %272 = vector.extract_strided_slice %268 {offsets = [0, 32], sizes = [8, 32], strides = [1, 1]} : vector<16x128xbf16> to vector<8x32xbf16>
    %273 = vector.extract_strided_slice %268 {offsets = [0, 64], sizes = [8, 32], strides = [1, 1]} : vector<16x128xbf16> to vector<8x32xbf16>
    %274 = vector.extract_strided_slice %268 {offsets = [0, 96], sizes = [8, 32], strides = [1, 1]} : vector<16x128xbf16> to vector<8x32xbf16>
    %275 = vector.extract_strided_slice %268 {offsets = [8, 0], sizes = [8, 32], strides = [1, 1]} : vector<16x128xbf16> to vector<8x32xbf16>
    %276 = vector.extract_strided_slice %268 {offsets = [8, 32], sizes = [8, 32], strides = [1, 1]} : vector<16x128xbf16> to vector<8x32xbf16>
    %277 = vector.extract_strided_slice %268 {offsets = [8, 64], sizes = [8, 32], strides = [1, 1]} : vector<16x128xbf16> to vector<8x32xbf16>
    %278 = vector.extract_strided_slice %268 {offsets = [8, 96], sizes = [8, 32], strides = [1, 1]} : vector<16x128xbf16> to vector<8x32xbf16>
    %279 = vector.shape_cast %271 : vector<8x32xbf16> to vector<1x8x32xbf16>
    %280 = vector.shape_cast %272 : vector<8x32xbf16> to vector<1x8x32xbf16>
    %281 = vector.shape_cast %273 : vector<8x32xbf16> to vector<1x8x32xbf16>
    %282 = vector.shape_cast %274 : vector<8x32xbf16> to vector<1x8x32xbf16>
    %283 = vector.shape_cast %275 : vector<8x32xbf16> to vector<1x8x32xbf16>
    %284 = vector.shape_cast %276 : vector<8x32xbf16> to vector<1x8x32xbf16>
    %285 = vector.shape_cast %277 : vector<8x32xbf16> to vector<1x8x32xbf16>
    %286 = vector.shape_cast %278 : vector<8x32xbf16> to vector<1x8x32xbf16>
    %287 = tpu.concatenate %279, %280, %281, %282, %283, %284, %285, %286 in 0 : vector<1x8x32xbf16>, vector<1x8x32xbf16>, vector<1x8x32xbf16>, vector<1x8x32xbf16>, vector<1x8x32xbf16>, vector<1x8x32xbf16>, vector<1x8x32xbf16>, vector<1x8x32xbf16> -> vector<8x8x32xbf16>
    %288 = vector.extract_strided_slice %269 {offsets = [0, 0], sizes = [17, 32], strides = [1, 1]} : vector<34x128xbf16> to vector<17x32xbf16>
    %289 = vector.extract_strided_slice %269 {offsets = [0, 32], sizes = [17, 32], strides = [1, 1]} : vector<34x128xbf16> to vector<17x32xbf16>
    %290 = vector.extract_strided_slice %269 {offsets = [0, 64], sizes = [17, 32], strides = [1, 1]} : vector<34x128xbf16> to vector<17x32xbf16>
    %291 = vector.extract_strided_slice %269 {offsets = [0, 96], sizes = [17, 32], strides = [1, 1]} : vector<34x128xbf16> to vector<17x32xbf16>
    %292 = vector.extract_strided_slice %269 {offsets = [17, 0], sizes = [17, 32], strides = [1, 1]} : vector<34x128xbf16> to vector<17x32xbf16>
    %293 = vector.extract_strided_slice %269 {offsets = [17, 32], sizes = [17, 32], strides = [1, 1]} : vector<34x128xbf16> to vector<17x32xbf16>
    %294 = vector.extract_strided_slice %269 {offsets = [17, 64], sizes = [17, 32], strides = [1, 1]} : vector<34x128xbf16> to vector<17x32xbf16>
    %295 = vector.extract_strided_slice %269 {offsets = [17, 96], sizes = [17, 32], strides = [1, 1]} : vector<34x128xbf16> to vector<17x32xbf16>
    %296 = vector.shape_cast %288 : vector<17x32xbf16> to vector<1x17x32xbf16>
    %297 = vector.shape_cast %289 : vector<17x32xbf16> to vector<1x17x32xbf16>
    %298 = vector.shape_cast %290 : vector<17x32xbf16> to vector<1x17x32xbf16>
    %299 = vector.shape_cast %291 : vector<17x32xbf16> to vector<1x17x32xbf16>
    %300 = vector.shape_cast %292 : vector<17x32xbf16> to vector<1x17x32xbf16>
    %301 = vector.shape_cast %293 : vector<17x32xbf16> to vector<1x17x32xbf16>
    %302 = vector.shape_cast %294 : vector<17x32xbf16> to vector<1x17x32xbf16>
    %303 = vector.shape_cast %295 : vector<17x32xbf16> to vector<1x17x32xbf16>
    %304 = tpu.concatenate %296, %297, %298, %299, %300, %301, %302, %303 in 0 : vector<1x17x32xbf16>, vector<1x17x32xbf16>, vector<1x17x32xbf16>, vector<1x17x32xbf16>, vector<1x17x32xbf16>, vector<1x17x32xbf16>, vector<1x17x32xbf16>, vector<1x17x32xbf16> -> vector<8x17x32xbf16>
    %305 = vector.extract_strided_slice %270 {offsets = [0, 0], sizes = [17, 32], strides = [1, 1]} : vector<34x128xbf16> to vector<17x32xbf16>
    %306 = vector.extract_strided_slice %270 {offsets = [0, 32], sizes = [17, 32], strides = [1, 1]} : vector<34x128xbf16> to vector<17x32xbf16>
    %307 = vector.extract_strided_slice %270 {offsets = [0, 64], sizes = [17, 32], strides = [1, 1]} : vector<34x128xbf16> to vector<17x32xbf16>
    %308 = vector.extract_strided_slice %270 {offsets = [0, 96], sizes = [17, 32], strides = [1, 1]} : vector<34x128xbf16> to vector<17x32xbf16>
    %309 = vector.extract_strided_slice %270 {offsets = [17, 0], sizes = [17, 32], strides = [1, 1]} : vector<34x128xbf16> to vector<17x32xbf16>
    %310 = vector.extract_strided_slice %270 {offsets = [17, 32], sizes = [17, 32], strides = [1, 1]} : vector<34x128xbf16> to vector<17x32xbf16>
    %311 = vector.extract_strided_slice %270 {offsets = [17, 64], sizes = [17, 32], strides = [1, 1]} : vector<34x128xbf16> to vector<17x32xbf16>
    %312 = vector.extract_strided_slice %270 {offsets = [17, 96], sizes = [17, 32], strides = [1, 1]} : vector<34x128xbf16> to vector<17x32xbf16>
    %313 = vector.shape_cast %305 : vector<17x32xbf16> to vector<1x17x32xbf16>
    %314 = vector.shape_cast %306 : vector<17x32xbf16> to vector<1x17x32xbf16>
    %315 = vector.shape_cast %307 : vector<17x32xbf16> to vector<1x17x32xbf16>
    %316 = vector.shape_cast %308 : vector<17x32xbf16> to vector<1x17x32xbf16>
    %317 = vector.shape_cast %309 : vector<17x32xbf16> to vector<1x17x32xbf16>
    %318 = vector.shape_cast %310 : vector<17x32xbf16> to vector<1x17x32xbf16>
    %319 = vector.shape_cast %311 : vector<17x32xbf16> to vector<1x17x32xbf16>
    %320 = vector.shape_cast %312 : vector<17x32xbf16> to vector<1x17x32xbf16>
    %321 = tpu.concatenate %313, %314, %315, %316, %317, %318, %319, %320 in 0 : vector<1x17x32xbf16>, vector<1x17x32xbf16>, vector<1x17x32xbf16>, vector<1x17x32xbf16>, vector<1x17x32xbf16>, vector<1x17x32xbf16>, vector<1x17x32xbf16>, vector<1x17x32xbf16> -> vector<8x17x32xbf16>
    "tpu.trace_start"() <{level = 10 : i32, message = "nqd,nkd->nqk"}> : () -> ()
    %cst_61 = arith.constant dense<0.000000e+00> : vector<8x8x17xf32>
    %322 = tpu.matmul %287, %304, %cst_61 {dimension_numbers = #tpu.dot_dimension_numbers<[2], [2], [1], [1], [0, 0, 0, 1, 1, 1], [0], [0]>} : vector<8x8x32xbf16>, vector<8x17x32xbf16>, vector<8x8x17xf32> -> vector<8x8x17xf32>
    "tpu.trace_stop"() : () -> ()
    %cst_62 = arith.constant dense<0xFF800000> : vector<8x8xf32>
    %323 = vector.multi_reduction <maximumf>, %322, %cst_62 [2] : vector<8x8x17xf32> to vector<8x8xf32>
    %324 = vector.shape_cast %323 : vector<8x8xf32> to vector<8x8x1xf32>
    %325 = vector.broadcast %324 : vector<8x8x1xf32> to vector<8x8x17xf32>
    %326 = arith.subf %322, %325 : vector<8x8x17xf32>
    %327 = math.exp %326 : vector<8x8x17xf32>
    %cst_63 = arith.constant dense<0.000000e+00> : vector<8x8xf32>
    %328 = vector.multi_reduction <add>, %327, %cst_63 [2] : vector<8x8x17xf32> to vector<8x8xf32>
    %329 = vector.shape_cast %328 : vector<8x8xf32> to vector<8x8x1xf32>
    %cst_64 = arith.constant 9.99999968E-21 : f32
    %330 = vector.broadcast %cst_64 : f32 to vector<8x8x1xf32>
    %331 = arith.maximumf %329, %330 : vector<8x8x1xf32>
    %332 = tpu.reciprocal %331 {approx = true} : vector<8x8x1xf32> -> vector<8x8x1xf32>
    %333 = vector.broadcast %332 : vector<8x8x1xf32> to vector<8x8x17xf32>
    %334 = arith.mulf %327, %333 : vector<8x8x17xf32>
    %335 = arith.truncf %334 : vector<8x8x17xf32> to vector<8x8x17xbf16>
    "tpu.trace_start"() <{level = 10 : i32, message = "nqk,nkd->nqd"}> : () -> ()
    %cst_65 = arith.constant dense<0.000000e+00> : vector<8x8x32xf32>
    %336 = tpu.matmul %335, %321, %cst_65 {dimension_numbers = #tpu.dot_dimension_numbers<[2], [1], [1], [2], [0, 0, 0, 1, 1, 2], [0], [0]>} : vector<8x8x17xbf16>, vector<8x17x32xbf16>, vector<8x8x32xf32> -> vector<8x8x32xf32>
    "tpu.trace_stop"() : () -> ()
    %337 = vector.extract_strided_slice %336 {offsets = [0, 0, 0], sizes = [1, 8, 32], strides = [1, 1, 1]} : vector<8x8x32xf32> to vector<1x8x32xf32>
    %338 = vector.shape_cast %337 : vector<1x8x32xf32> to vector<8x32xf32>
    %339 = vector.extract_strided_slice %336 {offsets = [1, 0, 0], sizes = [1, 8, 32], strides = [1, 1, 1]} : vector<8x8x32xf32> to vector<1x8x32xf32>
    %340 = vector.shape_cast %339 : vector<1x8x32xf32> to vector<8x32xf32>
    %341 = vector.extract_strided_slice %336 {offsets = [2, 0, 0], sizes = [1, 8, 32], strides = [1, 1, 1]} : vector<8x8x32xf32> to vector<1x8x32xf32>
    %342 = vector.shape_cast %341 : vector<1x8x32xf32> to vector<8x32xf32>
    %343 = vector.extract_strided_slice %336 {offsets = [3, 0, 0], sizes = [1, 8, 32], strides = [1, 1, 1]} : vector<8x8x32xf32> to vector<1x8x32xf32>
    %344 = vector.shape_cast %343 : vector<1x8x32xf32> to vector<8x32xf32>
    %345 = tpu.concatenate %338, %340, %342, %344 in 1 : vector<8x32xf32>, vector<8x32xf32>, vector<8x32xf32>, vector<8x32xf32> -> vector<8x128xf32>
    %346 = vector.extract_strided_slice %336 {offsets = [4, 0, 0], sizes = [1, 8, 32], strides = [1, 1, 1]} : vector<8x8x32xf32> to vector<1x8x32xf32>
    %347 = vector.shape_cast %346 : vector<1x8x32xf32> to vector<8x32xf32>
    %348 = vector.extract_strided_slice %336 {offsets = [5, 0, 0], sizes = [1, 8, 32], strides = [1, 1, 1]} : vector<8x8x32xf32> to vector<1x8x32xf32>
    %349 = vector.shape_cast %348 : vector<1x8x32xf32> to vector<8x32xf32>
    %350 = vector.extract_strided_slice %336 {offsets = [6, 0, 0], sizes = [1, 8, 32], strides = [1, 1, 1]} : vector<8x8x32xf32> to vector<1x8x32xf32>
    %351 = vector.shape_cast %350 : vector<1x8x32xf32> to vector<8x32xf32>
    %352 = vector.extract_strided_slice %336 {offsets = [7, 0, 0], sizes = [1, 8, 32], strides = [1, 1, 1]} : vector<8x8x32xf32> to vector<1x8x32xf32>
    %353 = vector.shape_cast %352 : vector<1x8x32xf32> to vector<8x32xf32>
    %354 = tpu.concatenate %347, %349, %351, %353 in 1 : vector<8x32xf32>, vector<8x32xf32>, vector<8x32xf32>, vector<8x32xf32> -> vector<8x128xf32>
    %355 = tpu.concatenate %345, %354 in 0 : vector<8x128xf32>, vector<8x128xf32> -> vector<16x128xf32>
    %356 = arith.truncf %355 : vector<16x128xf32> to vector<16x128xbf16>
    %cst_66 = arith.constant dense<0.000000e+00> : vector<16x128xf32>
    %357 = tpu.matmul %356, %202, %cst_66 {dimension_numbers = #tpu.dot_dimension_numbers<[1], [0], [0], [1], [0, 0, 1, 1], [], []>} : vector<16x128xbf16>, vector<128x128xbf16>, vector<16x128xf32> -> vector<16x128xf32>
    %358 = vector.extract_strided_slice %199 {offsets = [7, 0], sizes = [1, 128], strides = [1, 1]} : vector<8x128xf32> to vector<1x128xf32>
    %359 = vector.broadcast %358 : vector<1x128xf32> to vector<16x128xf32>
    %360 = arith.addf %357, %359 : vector<16x128xf32>
    %361 = vector.extract_strided_slice %360 {offsets = [0, 0], sizes = [1, 128], strides = [1, 1]} : vector<16x128xf32> to vector<1x128xf32>
    %362 = vector.extract_strided_slice %360 {offsets = [8, 0], sizes = [1, 128], strides = [1, 1]} : vector<16x128xf32> to vector<1x128xf32>
    %363 = tpu.concatenate %361, %362 in 0 : vector<1x128xf32>, vector<1x128xf32> -> vector<2x128xf32>
    %c0_67 = arith.constant 0 : index
    %c0_68 = arith.constant 0 : index
    %364 = vector.load %arg9[%c0_67, %c0_68] : memref<2x128xf32, #tpu.memory_space<vmem>>, vector<2x128xf32>
    tpu.vector_store %arg9[%c0_67, %c0_68], %363 {strides = array<i32>} : memref<2x128xf32, #tpu.memory_space<vmem>>, vector<2x128xf32>,
    return
  }
}

</mosaic_0001>

<bundles_post_ra>
// kernel: visual_model_forward.1
= control target key start
LH: loop header
LB: loop body
LE: loop exit
PB: predicated region body
PF: predicated region fallthrough
CT: control target
= control target key end

     0   :  { %v2662_v2 = vmov 128.0   ;;  %vm75_vm1 = vcmask 523264   ;;  %vm108_vm8 = vcmask 1040384   ;;  %vm466_vm9 = vcmask 261120   ;;  %s2665_s14 = smov 96   ;;  %s3681_s3 = inlined_call_operand.vmem [shape: f32[16,128], index: 3, kind: input, shape index: {}]   ;;  %s3682_s5 = inlined_call_operand.vmem [shape: bf16[64,128], index: 5, kind: input, shape index: {}]   ;;  %s3683_s0 = inlined_call_operand.vmem [shape: f32[32,64], index: 0, kind: input, shape index: {}]   ;;  %s3684_s6 = inlined_call_operand.vmem [shape: f32[1,128], index: 6, kind: input, shape index: {}]   ;;  %s3685_s7 = inlined_call_operand.vmem [shape: bf16[2,128,512], index: 7, kind: input, shape index: {}]   ;;  %s3686_s8 = inlined_call_operand.vmem [shape: f32[2,8,128], index: 8, kind: input, shape index: {}]   ;;  %s3687_s1 = inlined_call_operand.vmem [shape: f32[16,128], index: 1, kind: input, shape index: {}]   ;;  %s3688_s2 = inlined_call_operand.vmem [shape: f32[1,128], index: 2, kind: input, shape index: {}]   ;;  %s3689_s4 = inlined_call_operand.vmem [shape: f32[2,1,8], index: 4, kind: input, shape index: {}]   ;;  %s3690_s9 = inlined_call_operand.vmem [shape: f32[2,128], index: 9, kind: output, shape index: {}]  }
   0x1   :  { %v135_v0 = vld [vmem:[%s3681_s3] sm:$0xff]  ;;  %v136_v1 = vld [vmem:[%s3681_s3 + $0x8] sm:$0xff]  ;;  %2577 = vrcp.f32 %v2662_v2  ;;  %v2474_v5 = vld [vmem:[%s3682_s5 + $0x18] sm:$0xff]  ;;  %vm727_vm10 = vcmask 1043456   ;;  %vm619_vm11 = vcmask 64512   ;;  %vm1045_vm12 = vcmask 1041408  }
   0x2   :  { %172 = vadd.xlane.f32.xlu0 %v135_v0  ;;  %86 = vmatpush.bf16.msra.mxu1 %v2474_v5  ;;  %v2473_v6 = vld [vmem:[%s3682_s5 + $0x10] sm:$0xff]  ;;  %v2472_v8 = vld [vmem:[%s3682_s5 + $0x8] sm:$0xff]  ;;  %v2471_v10 = vld [vmem:[%s3682_s5] sm:$0xff]  ;;  %vm891_vm13 = vcmask 785408  }
   0x3   :  { %v33_v11 = vld [vmem:[%s3683_s0] sm:$0xff]  ;;  %v34_v12 = vld [vmem:[%s3683_s0 + $0x8] sm:$0xff]  ;;  %v35_v24 = vld [vmem:[%s3683_s0 + $0x10] sm:$0xff] }
   0x4   :  { %v37_v14 = vpack.c.bf16 %v34_v12, %v33_v11  ;;  %v36_v25 = vld [vmem:[%s3683_s0 + $0x18] sm:$0xff]  ;;  %v2503_v27 = vld [vmem:[%s3685_s7 + $0xe4] sm:$0xf]  ;;  %v2238_v28 = vld [vmem:[%s3685_s7 + $0xf0] sm:$0xf0] }
   0x5   :  { %v38_v26 = vpack.c.bf16 %v36_v25, %v35_v24  ;;  %v2244_v29 = vld [vmem:[%s3685_s7 + $0xe8] sm:$0xf]  ;;  %v2241_v30 = vor.u32 %v2503_v27, %v2238_v28  ;;  %v2506_v31 = vld [vmem:[%s3685_s7 + $0xf4] sm:$0xf0]  ;;  %v2180_v33 = vld [vmem:[%s3685_s7 + $0xe0] sm:$0xf] }
   0x6   :  { %87 = vmatpush.bf16.msra.mxu1 %v2473_v6  ;;  %v2245_v32 = vor.u32 %v2506_v31, %v2244_v29  ;;  %v2505_v34 = vld [vmem:[%s3685_s7 + $0xec] sm:$0xf0]  ;;  %v2499_v36 = vld [vmem:[%s3685_s7 + $0xc4] sm:$0xf]  ;;  %v2230_v37 = vld [vmem:[%s3685_s7 + $0xd0] sm:$0xf0] }
   0x7   :  { %v2578_v3 = vpop.eup %2577  ;;  %378 = vmatpush.bf16.msra.mxu2 %v2241_v30  ;;  %v2181_v35 = vor.u32 %v2505_v34, %v2180_v33  ;;  %v2236_v38 = vld [vmem:[%s3685_s7 + $0xc8] sm:$0xf]  ;;  %v2233_v39 = vor.u32 %v2499_v36, %v2230_v37  ;;  %v2502_v40 = vld [vmem:[%s3685_s7 + $0xd4] sm:$0xf0]  ;;  %v2176_v42 = vld [vmem:[%s3685_s7 + $0xc0] sm:$0xf] }
   0x8   :  { %v177_v4 = vmul.f32 128.0, %v2578_v3  ;;  %vm181_vm0 = vweird.f32 %v2578_v3  ;;  %392 = vmatpush.bf16.msra.mxu3 %v2245_v32  ;;  %v2237_v41 = vor.u32 %v2502_v40, %v2236_v38  ;;  %v2501_v43 = vld [vmem:[%s3685_s7 + $0xcc] sm:$0xf0]  ;;  %v2495_v45 = vld [vmem:[%s3685_s7 + $0xa4] sm:$0xf] }
   0x9   :  { %v2177_v44 = vor.u32 %v2501_v43, %v2176_v42  ;;  %v2222_v46 = vld [vmem:[%s3685_s7 + $0xb0] sm:$0xf0]  ;;  %v2228_v47 = vld [vmem:[%s3685_s7 + $0xa8] sm:$0xf]  ;;  %v2498_v49 = vld [vmem:[%s3685_s7 + $0xb4] sm:$0xf0] }
   0xa   :  { %174 = vadd.xlane.f32.xlu0 %v136_v1  ;;  %v178_v7 = vsub.f32 1.0, %v177_v4  ;;  %88 = vmatpush.bf16.msra.mxu1 %v2472_v8  ;;  %v2225_v48 = vor.u32 %v2495_v45, %v2222_v46  ;;  %v2229_v50 = vor.u32 %v2498_v49, %v2228_v47  ;;  %v2172_v51 = vld [vmem:[%s3685_s7 + $0xa0] sm:$0xf]  ;;  %v2497_v52 = vld [vmem:[%s3685_s7 + $0xac] sm:$0xf0] }
   0xb   :  { %379 = vmatpush.bf16.msra.mxu2 %v2233_v39  ;;  %v2173_v53 = vor.u32 %v2497_v52, %v2172_v51  ;;  %v2491_v54 = vld [vmem:[%s3685_s7 + $0x84] sm:$0xf]  ;;  %v2214_v55 = vld [vmem:[%s3685_s7 + $0x90] sm:$0xf0]  ;;  %v2220_v56 = vld [vmem:[%s3685_s7 + $0x88] sm:$0xf] }
   0xc   :  { %v179_v9 = vmul.f32 %v2578_v3, %v178_v7  ;;  %393 = vmatpush.bf16.msra.mxu3 %v2237_v41  ;;  %v2217_v57 = vor.u32 %v2491_v54, %v2214_v55  ;;  %v2494_v58 = vld [vmem:[%s3685_s7 + $0x94] sm:$0xf0]  ;;  %v2168_v60 = vld [vmem:[%s3685_s7 + $0x80] sm:$0xf]  ;;  %v2493_v61 = vld [vmem:[%s3685_s7 + $0x8c] sm:$0xf0] }
   0xd   :  { %v2221_v59 = vor.u32 %v2494_v58, %v2220_v56  ;;  %v2169_v62 = vor.u32 %v2493_v61, %v2168_v60  ;;  %v2487_v63 = vld [vmem:[%s3685_s7 + $0x64] sm:$0xf]  ;;  %v2164_v5 = vld [vmem:[%s3685_s7 + $0x60] sm:$0xf]  ;;  %v2489_v6 = vld [vmem:[%s3685_s7 + $0x6c] sm:$0xf0] }
   0xe   :  { %v180_v13 = vadd.f32 %v2578_v3, %v179_v9  ;;  %89 = vmatpush.bf16.msra.mxu1 %v2471_v10  ;;  %v2165_v7 = vor.u32 %v2489_v6, %v2164_v5  ;;  %v2483_v8 = vld [vmem:[%s3685_s7 + $0x44] sm:$0xf]  ;;  %v2198_v9 = vld [vmem:[%s3685_s7 + $0x50] sm:$0xf0]  ;;  %v2204_v10 = vld [vmem:[%s3685_s7 + $0x48] sm:$0xf] }
   0xf   :  { %380 = vmatpush.bf16.msra.mxu2 %v2225_v48  ;;  %v2201_v11 = vor.u32 %v2483_v8, %v2198_v9  ;;  %v2486_v12 = vld [vmem:[%s3685_s7 + $0x54] sm:$0xf0]  ;;  %v2156_v25 = vld [vmem:[%s3685_s7 + $0x20] sm:$0xf]  ;;  %v2475_v29 = vld [vmem:[%s3685_s7 + $0x4] sm:$0xf] }
  0x10   :  { %v2741_v15 = vsel %vm181_vm0, %v2578_v3, %v180_v13  ;;  %394 = vmatpush.bf16.msra.mxu3 %v2229_v50  ;;  %v2490_v3 = vld [vmem:[%s3685_s7 + $0x74] sm:$0xf0]  ;;  %v2205_v13 = vor.u32 %v2486_v12, %v2204_v10  ;;  %v2182_v30 = vld [vmem:[%s3685_s7 + $0x10] sm:$0xf0]  ;;  %v2188_v31 = vld [vmem:[%s3685_s7 + $0x8] sm:$0xf] }
  0x11   :  { %2148 = vmatmul.msk.bf16.vlgmr.msra.gmra.mxu1 %vm75_vm1, %v37_v14  ;;  %v2160_v14 = vld [vmem:[%s3685_s7 + $0x40] sm:$0xf]  ;;  %v2482_v24 = vld [vmem:[%s3685_s7 + $0x34] sm:$0xf0]  ;;  %v2477_v34 = vld [vmem:[%s3685_s7 + $0xc] sm:$0xf0]  ;;  %v2185_v36 = vor.u32 %v2475_v29, %v2182_v30 }
  0x12   :  { %284 = vmatpush.bf16.msrb.mxu1 %v2181_v35  ;;  %v2478_v32 = vld [vmem:[%s3685_s7 + $0x14] sm:$0xf0]  ;;  %v2152_v33 = vld [vmem:[%s3685_s7] sm:$0xf] }
  0x13   :  { %381 = vmatpush.bf16.msra.mxu2 %v2217_v57  ;;  %v2189_v38 = vor.u32 %v2478_v32, %v2188_v31  ;;  %v2153_v39 = vor.u32 %v2477_v34, %v2152_v33 }
  0x14   :  { %395 = vmatpush.bf16.msra.mxu3 %v2221_v59 }
  0x16   :  { %285 = vmatpush.bf16.msrb.mxu1 %v2177_v44 }
  0x1a   :  { %286 = vmatpush.bf16.msrb.mxu1 %v2173_v53  ;;  %v2910_v53 = vld [vmem:[%s3686_s8] sm:$0xff] }
  0x1b   :  { %v219_v57 = vperm.slane %v2910_v53, 0  ;;  %v225_v59 = vperm.slane %v2910_v53, 2 }
  0x1e   :  { %287 = vmatpush.bf16.msrb.mxu1 %v2169_v62  ;;  %v222_v62 = vperm.slane %v2910_v53, 1 }
  0x21   :  { %2149 = vmatmul.msk.bf16.gmra.mxu1 %vm75_vm1, %v38_v26  ;;  %v2481_v26 = vld [vmem:[%s3685_s7 + $0x2c] sm:$0xf0] }
  0x22   :  { %288 = vmatpush.bf16.msrb.mxu1 %v2165_v7  ;;  %v2157_v28 = vor.u32 %v2481_v26, %v2156_v25 }
  0x75   :  { %v173_v16 = vpop.xlane.xlu0 %172 }
  0x76   :  { %v183_v17 = vmul.f32 %v2741_v15, %v173_v16  ;;  %v2485_v16 = vld [vmem:[%s3685_s7 + $0x4c] sm:$0xf0] }
  0x78   :  { %v2745_v18 = vsub.f32 %v135_v0, %v183_v17  ;;  %v2206_v0 = vld [vmem:[%s3685_s7 + $0x70] sm:$0xf0]  ;;  %v2161_v17 = vor.u32 %v2485_v16, %v2160_v14  ;;  %v101_v16 = vld [vmem:[%s3687_s1] sm:$0xff] }
  0x79   :  { %v2209_v2 = vor.u32 %v2487_v63, %v2206_v0 }
  0x7a   :  { %v187_v19 = vmul.f32 %v2745_v18, %v2745_v18  ;;  %289 = vmatpush.bf16.msrb.mxu1 %v2161_v17 }
  0x7b   :  { %382 = vmatpush.bf16.msra.mxu2 %v2209_v2  ;;  %v228_v2 = vperm.slane %v2910_v53, 3 }
  0x7c   :  { %189 = vadd.xlane.f32.xlu1 %v187_v19  ;;  %v2479_v19 = vld [vmem:[%s3685_s7 + $0x24] sm:$0xf] }
  0x7d   :  { %v175_v20 = vpop.xlane.xlu0 %174 }
  0x7e   :  { %v184_v21 = vmul.f32 %v2741_v15, %v175_v20  ;;  %v2190_v20 = vld [vmem:[%s3685_s7 + $0x30] sm:$0xf0]  ;;  %290 = vmatpush.bf16.msrb.mxu1 %v2157_v28 }
  0x7f   :  { %383 = vmatpush.bf16.msra.mxu2 %v2201_v11 }
  0x80   :  { %v2750_v22 = vsub.f32 %v136_v1, %v184_v21  ;;  %v2212_v1 = vld [vmem:[%s3685_s7 + $0x68] sm:$0xf] }
  0x81   :  { %v2213_v4 = vor.u32 %v2490_v3, %v2212_v1  ;;  %v2196_v21 = vld [vmem:[%s3685_s7 + $0x28] sm:$0xf] }
  0x82   :  { %v188_v23 = vmul.f32 %v2750_v22, %v2750_v22  ;;  %v2197_v27 = vor.u32 %v2482_v24, %v2196_v21  ;;  %291 = vmatpush.bf16.msrb.mxu1 %v2153_v39  ;;  %v235_v39 = vperm.slane %v2910_v53, 4 }
  0x83   :  { %396 = vmatpush.bf16.msra.mxu3 %v2213_v4 }
  0x84   :  { %191 = vadd.xlane.f32.xlu1 %v188_v23  ;;  %v2193_v23 = vor.u32 %v2479_v19, %v2190_v20 }
  0x86   :  { %384 = vmatpush.bf16.msra.mxu2 %v2193_v23  ;;  %v105_v23 = vld [vmem:[%s3688_s2] sm:$0x1]  ;;  %s2664_s2 = smov 64  }
  0x87   :  { %397 = vmatpush.bf16.msra.mxu3 %v2205_v13 }
  0x8a   :  { %385 = vmatpush.bf16.msra.mxu2 %v2185_v36 }
  0x8b   :  { %398 = vmatpush.bf16.msra.mxu3 %v2197_v27  ;;  %v2945_v27 = vld [vmem:[%s3687_s1 + $0x8] sm:$0xff]  ;;  %s2663_s1 = smov 32  }
  0x8e   :  { %v91_v12 = vpop.f32.mrf.mxu1 }
  0x8f   :  { %399 = vmatpush.bf16.msra.mxu3 %v2189_v38 }
  0x96   :  { %v2918_v13 = vpop.f32.mrf.mxu1 }
  0x9e   :  { %v96_v17 = vpop.f32.mrf.mxu1 }
  0xa6   :  { %v98_v21 = vpop.f32.mrf.mxu1 }
  0xef   :  { %v190_v35 = vpop.xlane.xlu1 %189 }
  0xf0   :  { %v193_v37 = vmul.f32 %v190_v35, %v2741_v15 }
  0xf2   :  { %v195_v40 = vadd.f32 1e-05, %v193_v37 }
  0xf4   :  { %2579 = vrsqrt.f32 %v195_v40  ;;  %vm203_vm3 = vweird.f32 %v195_v40 }
  0xf7   :  { %v192_v41 = vpop.xlane.xlu1 %191 }
  0xf8   :  { %v194_v42 = vmul.f32 %v192_v41, %v2741_v15 }
  0xfa   :  { %v2580_v43 = vpop.eup %2579  ;;  %v196_v44 = vadd.f32 1e-05, %v194_v42  ;;  %v406_v42 = vperm.slane %v2910_v53, 5 }
  0xfb   :  { %v198_v45 = vmul.f32 %v2580_v43, %v195_v40  ;;  %vm204_vm2 = vweird.f32 %v2580_v43 }
  0xfc   :  { %2581 = vrsqrt.f32 %v196_v44  ;;  %vm205_vm4 = vmor %vm203_vm3, %vm204_vm2  ;;  %vm213_vm6 = vweird.f32 %v196_v44 }
  0xfd   :  { %v199_v46 = vmul.f32 %v2580_v43, %v198_v45 }
  0xff   :  { %v200_v47 = vmul.f32 0.5, %v199_v46 }
 0x101   :  { %v201_v48 = vsub.f32 1.5, %v200_v47 }
 0x102   :  { %v2582_v49 = vpop.eup %2581 }
 0x103   :  { %v202_v50 = vmul.f32 %v2580_v43, %v201_v48  ;;  %v208_v51 = vmul.f32 %v2582_v49, %v196_v44  ;;  %vm214_vm5 = vweird.f32 %v2582_v49 }
 0x104   :  { %vm215_vm7 = vmor %vm213_vm6, %vm214_vm5 }
 0x105   :  { %v209_v52 = vmul.f32 %v2582_v49, %v208_v51  ;;  %v206_v54 = vsel %vm205_vm4, %v2580_v43, %v202_v50 }
 0x106   :  { %v217_v56 = vmul.f32 %v206_v54, %v2745_v18 }
 0x107   :  { %v210_v55 = vmul.f32 0.5, %v209_v52 }
 0x108   :  { %v220_v61 = vmul.f32 %v219_v57, %v217_v56  ;;  %v226_v1 = vmul.f32 %v225_v59, %v217_v56 }
 0x109   :  { %v211_v58 = vsub.f32 1.5, %v210_v55 }
 0x10a   :  { %v223_v4 = vadd.f32 %v222_v62, %v220_v61  ;;  %v229_v5 = vadd.f32 %v228_v2, %v226_v1 }
 0x10b   :  { %v212_v60 = vmul.f32 %v2582_v49, %v211_v58 }
 0x10c   :  { %v231_v9 = vmul.f32 0.17677669, %v223_v4 }
 0x10d   :  { %v216_v63 = vsel %vm215_vm7, %v2582_v49, %v212_v60  ;;  %v409_v60 = vperm.slane %v2910_v53, 6 }
 0x10e   :  { %v218_v0 = vmul.f32 %v216_v63, %v2750_v22  ;;  %v2923_v22 = vld [vmem:[%s3684_s6] ss:$0 sm:$0xff] }
 0x10f   :  { %v92_v14 = vadd.f32 %v2923_v22, %v91_v12  ;;  %v97_v25 = vadd.f32 %v2923_v22, %v96_v17  ;;  %v99_v26 = vadd.f32 %v2923_v22, %v98_v21  ;;  %v2575_v17 = vld [vmem:[%s3689_s4] ss:$0 sm:$0xff] }
 0x110   :  { %v227_v3 = vmul.f32 %v225_v59, %v218_v0  ;;  %v221_v18 = vmul.f32 %v219_v57, %v218_v0 }
 0x111   :  { %v2929_v19 = vadd.f32 %v101_v16, %v92_v14  ;;  %v116_v28 = vadd.f32 %v101_v16, %v97_v25  ;;  %v117_v29 = vadd.f32 %v2945_v27, %v99_v26 }
 0x112   :  { %v230_v6 = vadd.f32 %v228_v2, %v227_v3  ;;  %v224_v7 = vadd.f32 %v222_v62, %v221_v18 }
 0x113   :  { %v109_v20 = vrot.slane %v2929_v19, 7  ;;  %v120_v30 = vrot.slane %v116_v28, 7  ;;  %v121_v31 = vrot.slane %v117_v29, 7 }
 0x114   :  { %v234_v8 = vpack.c.bf16 %v230_v6, %v229_v5  ;;  %v232_v10 = vmul.f32 0.17677669, %v224_v7 }
 0x115   :  { %v2938_v24 = vsel %vm108_vm8, %v105_v23, %v109_v20  ;;  %v129_v32 = vrot.slane %v121_v31, 7  ;;  %v2949_v33 = vsel %vm108_vm8, %v105_v23, %v120_v30  ;;  %v122_v34 = vsel %vm108_vm8, %v120_v30, %v121_v31 }
 0x116   :  { %386 = vmatmul.bf16.vlgmr.msra.gmra.mxu2 %v234_v8  ;;  %400 = vmatmul.bf16.vlgmr.msra.gmra.mxu3 %v234_v8  ;;  %v233_v11 = vpack.c.bf16 %v232_v10, %v231_v9  ;;  %v127_v35 = vrot.slane %v122_v34, 7  ;;  %v126_v36 = vrot.slane %v2949_v33, 7 }
 0x118   :  { %292 = vmatmul.bf16.vlgmr.msrb.gmra.mxu1 %v233_v11  ;;  %v2954_v37 = vsel %vm108_vm8, %v127_v35, %v129_v32  ;;  %v2959_v38 = vsel %vm108_vm8, %v126_v36, %v127_v35 }
 0x195   :  { %v293_v40 = vpop.f32.mrf.mxu1 }
 0x196   :  { %v294_v41 = vadd.f32 %v293_v40, %v235_v39 }
 0x198   :  { %v412_v43 = vpack.c.bf16 %v294_v41, %v294_v41 }
 0x199   :  { %v387_v44 = vpop.f32.mrf.mxu2  ;;  %v401_v62 = vpop.f32.mrf.mxu3 }
 0x19a   :  { %v407_v45 = vadd.f32 %v406_v42, %v387_v44  ;;  %423 = vrot.lane.b32.xlu1 %v412_v43, %s2663_s1  ;;  %421 = vrot.lane.b32.xlu0 %v412_v43, %s2664_s2  ;;  %v410_v2 = vadd.f32 %v409_v60, %v401_v62 }
 0x19c   :  { %v414_v46 = vpack.c.bf16 %v407_v45, %v407_v45  ;;  %v2984_v18 = vpack.c.bf16 %v410_v2, %v410_v2 }
 0x19d   :  { %v295_v47 = vpop.f32.mrf.mxu1 }
 0x19e   :  { %v296_v48 = vadd.f32 %v295_v47, %v235_v39  ;;  %435 = vrot.lane.b32.xlu2 %v414_v46, %s2664_s2  ;;  %v471_v49 = vsel %vm466_vm9, %v414_v46, 0  ;;  %v729_v6 = vsel %vm727_vm10, %v2984_v18, 0  ;;  %v2576_v47 = vld [vmem:[%s3689_s4 + $0x1] ss:$0 sm:$0xff] }
 0x19f   :  { %480 = vmatpush.bf16.xpose.msra.mxu0 %v471_v49 }
 0x1a0   :  { %v413_v50 = vpack.c.bf16 %v296_v48, %v296_v48 }
 0x1a1   :  { %v389_v51 = vpop.f32.mrf.mxu2  ;;  %v403_v9 = vpop.f32.mrf.mxu3 }
 0x1a2   :  { %430 = vrot.lane.b32.xlu1 %v413_v50, %s2663_s1  ;;  %419 = vrot.lane.b32.xlu0 %v412_v43, %s2665_s14  ;;  %v408_v52 = vadd.f32 %v406_v42, %v389_v51  ;;  %v411_v11 = vadd.f32 %v409_v60, %v403_v9 }
 0x1a4   :  { %v415_v54 = vpack.c.bf16 %v408_v52, %v408_v52  ;;  %v2995_v21 = vpack.c.bf16 %v411_v11, %v411_v11 }
 0x1a6   :  { %437 = vrot.lane.b32.xlu2 %v414_v46, %s2663_s1  ;;  %2246 = vmatmul.msk.bf16.vlgmr.msra.gmra.mxu0 %vm466_vm9, %v412_v43  ;;  %v547_v63 = vsel %vm466_vm9, %v415_v54, 0  ;;  %v805_v26 = vsel %vm727_vm10, %v2995_v21, 0 }
 0x1aa   :  { %440 = vrot.lane.b32.xlu0 %v415_v54, %s2665_s14 }
 0x1ae   :  { %433 = vrot.lane.b32.xlu2 %v414_v46, %s2665_s14 }
 0x1b6   :  { %442 = vrot.lane.b32.xlu2 %v415_v54, %s2664_s2 }
 0x1be   :  { %444 = vrot.lane.b32.xlu2 %v415_v54, %s2663_s1 }
 0x1c6   :  { %428 = vrot.lane.b32.xlu2 %v413_v50, %s2664_s2 }
 0x1ce   :  { %426 = vrot.lane.b32.xlu2 %v413_v50, %s2665_s14 }
 0x1f8   :  { %v436_v55 = vpop.permute.xlu2 %435 }
 0x1f9   :  { %v509_v56 = vsel %vm466_vm9, %v436_v55, 0 }
 0x1fa   :  { %518 = vmatpush.bf16.xpose.msrb.mxu2 %v509_v56 }
 0x200   :  { %v438_v57 = vpop.permute.xlu2 %437 }
 0x201   :  { %v528_v58 = vsel %vm466_vm9, %v438_v57, 0 }
 0x202   :  { %537 = vmatpush.bf16.xpose.msrb.mxu3 %v528_v58 }
 0x208   :  { %v434_v59 = vpop.permute.xlu2 %433 }
 0x209   :  { %v490_v61 = vsel %vm466_vm9, %v434_v59, 0 }
 0x20a   :  { %499 = vmatpush.bf16.xpose.msrb.mxu0 %v490_v61 }
 0x20c   :  { %v424_v0 = vpop.permute.xlu1 %423  ;;  %v422_v1 = vpop.permute.xlu0 %421 }
 0x20d   :  { %2248 = vmatmul.msk.bf16.vlgmr.msrb.gmra.mxu2 %vm466_vm9, %v422_v1  ;;  %2249 = vmatmul.msk.bf16.vlgmr.msrb.gmra.mxu3 %vm466_vm9, %v424_v0 }
 0x210   :  { %v443_v3 = vpop.permute.xlu2 %442 }
 0x211   :  { %v585_v4 = vsel %vm466_vm9, %v443_v3, 0 }
 0x212   :  { %556 = vmatpush.bf16.xpose.msra.mxu0 %v547_v63  ;;  %594 = vmatpush.bf16.xpose.msra.mxu2 %v585_v4 }
 0x214   :  { %v420_v5 = vpop.permute.xlu0 %419  ;;  %v431_v14 = vpop.permute.xlu1 %430 }
 0x215   :  { %2247 = vmatmul.msk.bf16.vlgmr.msrb.gmra.mxu0 %vm466_vm9, %v420_v5 }
 0x218   :  { %v445_v7 = vpop.permute.xlu2 %444 }
 0x219   :  { %v604_v8 = vsel %vm466_vm9, %v445_v7, 0 }
 0x21a   :  { %738 = vmatpush.bf16.msrb.mxu0 %v729_v6  ;;  %613 = vmatpush.bf16.xpose.msra.mxu3 %v604_v8 }
 0x21c   :  { %v441_v10 = vpop.permute.xlu0 %440 }
 0x21d   :  { %v566_v12 = vsel %vm466_vm9, %v441_v10, 0 }
 0x21e   :  { %575 = vmatpush.bf16.xpose.msra.mxu1 %v566_v12 }
 0x220   :  { %v429_v16 = vpop.permute.xlu2 %428 }
 0x221   :  { %2252 = vmatmul.msk.bf16.vlgmr.msra.gmra.mxu2 %vm466_vm9, %v429_v16  ;;  %2253 = vmatmul.msk.bf16.vlgmr.msra.gmra.mxu3 %vm466_vm9, %v431_v14 }
 0x223   :  { %v482_v23 = vpop.f32.mrf.mxu0 }
 0x224   :  { %v2999_v25 = vadd.f32 %v2575_v17, %v482_v23 }
 0x225   :  { %2250 = vmatmul.msk.bf16.vlgmr.msra.gmra.mxu0 %vm466_vm9, %v413_v50 }
 0x226   :  { %814 = vmatpush.bf16.msra.mxu0 %v805_v26  ;;  %v620_v28 = vsel %vm619_vm11, %v2999_v25, -inf }
 0x227   :  { %621 = vmax.xlane.f32.xlu1 %v620_v28 }
 0x228   :  { %v427_v29 = vpop.permute.xlu2 %426 }
 0x229   :  { %2251 = vmatmul.msk.bf16.vlgmr.msra.gmra.mxu1 %vm466_vm9, %v427_v29 }
 0x22b   :  { %v484_v30 = vpop.f32.mrf.mxu0 }
 0x290   :  { %v520_v31 = vpop.f32.mrf.mxu2  ;;  %v539_v32 = vpop.f32.mrf.mxu3 }
 0x291   :  { %v521_v34 = vadd.f32 %v2575_v17, %v520_v31  ;;  %v540_v35 = vadd.f32 %v2575_v17, %v539_v32 }
 0x292   :  { %v501_v39 = vpop.f32.mrf.mxu0 }
 0x293   :  { %v502_v40 = vadd.f32 %v2575_v17, %v501_v39  ;;  %v629_v41 = vsel %vm619_vm11, %v540_v35, -inf  ;;  %v626_v42 = vsel %vm619_vm11, %v521_v34, -inf }
 0x294   :  { %630 = vmax.xlane.f32.xlu0 %v629_v41  ;;  %627 = vmax.xlane.f32.xlu1 %v626_v42 }
 0x295   :  { %v623_v43 = vsel %vm619_vm11, %v502_v40, -inf }
 0x296   :  { %624 = vmax.xlane.f32.xlu2 %v623_v43 }
 0x298   :  { %v522_v44 = vpop.f32.mrf.mxu2  ;;  %v541_v45 = vpop.f32.mrf.mxu3 }
 0x29a   :  { %v503_v46 = vpop.f32.mrf.mxu0  ;;  %v622_v1 = vpop.xlane.xlu1 %621 }
 0x2a2   :  { %v558_v48 = vpop.f32.mrf.mxu0 }
 0x2a3   :  { %v3013_v49 = vadd.f32 %v2576_v47, %v558_v48 }
 0x2a4   :  { %v596_v50 = vpop.f32.mrf.mxu2  ;;  %v615_v51 = vpop.f32.mrf.mxu3 }
 0x2a5   :  { %v597_v52 = vadd.f32 %v2576_v47, %v596_v50  ;;  %v632_v54 = vsel %vm619_vm11, %v3013_v49, -inf  ;;  %v616_v57 = vadd.f32 %v2576_v47, %v615_v51 }
 0x2a6   :  { %v577_v55 = vpop.f32.mrf.mxu1  ;;  %633 = vmax.xlane.f32.xlu0 %v632_v54 }
 0x2a7   :  { %v638_v56 = vsel %vm619_vm11, %v597_v52, -inf  ;;  %v641_v61 = vsel %vm619_vm11, %v616_v57, -inf  ;;  %v578_v63 = vadd.f32 %v2576_v47, %v577_v55  ;;  %v644_v55 = vsub.f32 %v2999_v25, %v622_v1 }
 0x2a8   :  { %639 = vmax.xlane.f32.xlu1 %v638_v56 }
 0x2a9   :  { %v635_v0 = vsel %vm619_vm11, %v578_v63, -inf }
 0x2aa   :  { %v560_v58 = vpop.f32.mrf.mxu0 }
 0x2ab   :  { %v94_v58 = vadd.f32 %v2923_v22, %v2918_v13 }
 0x2ac   :  { %v598_v59 = vpop.f32.mrf.mxu2  ;;  %v617_v60 = vpop.f32.mrf.mxu3 }
 0x2ae   :  { %v579_v62 = vpop.f32.mrf.mxu1  ;;  %642 = vmax.xlane.f32.xlu0 %v641_v61  ;;  %449 = vrot.lane.b32.xlu2 %v2984_v18, %s2664_s2  ;;  %v104_v61 = vadd.f32 %v2945_v27, %v94_v58  ;;  %v1046_v27 = vsel %vm1045_vm12, %v2954_v37, 0.0 }
 0x2c1   :  { %451 = vrot.lane.b32.xlu1 %v2984_v18, %s2663_s1 }
 0x2c2   :  { %447 = vrot.lane.b32.xlu0 %v2984_v18, %s2665_s14 }
 0x2d7   :  { %636 = vmax.xlane.f32.xlu2 %v635_v0 }
 0x307   :  { %v631_v2 = vpop.xlane.xlu0 %630  ;;  %v628_v3 = vpop.xlane.xlu1 %627 }
 0x308   :  { %v647_v4 = vsub.f32 %v540_v35, %v631_v2  ;;  %v646_v5 = vsub.f32 %v521_v34, %v628_v3 }
 0x309   :  { %v625_v6 = vpop.xlane.xlu2 %624 }
 0x30a   :  { %v658_v7 = vmul.f32 1.442695, %v647_v4  ;;  %v656_v8 = vmul.f32 1.442695, %v646_v5  ;;  %v645_v9 = vsub.f32 %v502_v40, %v625_v6 }
 0x30c   :  { %2583 = vpow2.f32 %v658_v7  ;;  %v654_v10 = vmul.f32 1.442695, %v645_v9 }
 0x30d   :  { %2585 = vpow2.f32 %v656_v8 }
 0x30e   :  { %2587 = vpow2.f32 %v654_v10 }
 0x311   :  { %v450_v11 = vpop.permute.xlu2 %449 }
 0x312   :  { %v3026_v12 = vpop.eup %2583  ;;  %v767_v18 = vsel %vm727_vm10, %v450_v11, 0 }
 0x313   :  { %v3029_v14 = vpop.eup %2585  ;;  %776 = vmatpush.bf16.msrb.mxu2 %v767_v18  ;;  %v677_v16 = vsel %vm619_vm11, %v3026_v12, 0.0 }
 0x314   :  { %v3033_v17 = vpop.eup %2587  ;;  %678 = vadd.xlane.f32.xlu2 %v677_v16  ;;  %v674_v23 = vsel %vm619_vm11, %v3029_v14, 0.0 }
 0x315   :  { %675 = vadd.xlane.f32.xlu0 %v674_v23  ;;  %v671_v26 = vsel %vm619_vm11, %v3033_v17, 0.0 }
 0x316   :  { %672 = vadd.xlane.f32.xlu1 %v671_v26 }
 0x319   :  { %v634_v28 = vpop.xlane.xlu0 %633 }
 0x31a   :  { %v648_v54 = vsub.f32 %v3013_v49, %v634_v28  ;;  %v110_v49 = vrot.slane %v104_v61, 7 }
 0x31b   :  { %v640_v29 = vpop.xlane.xlu1 %639 }
 0x31c   :  { %v650_v30 = vsub.f32 %v597_v52, %v640_v29  ;;  %v660_v56 = vmul.f32 1.442695, %v648_v54  ;;  %v3075_v13 = vsel %vm108_vm8, %v110_v49, %v126_v36  ;;  %v3081_v22 = vsel %vm108_vm8, %v109_v20, %v110_v49 }
 0x31e   :  { %v664_v31 = vmul.f32 1.442695, %v650_v30 }
 0x320   :  { %2589 = vpow2.f32 %v664_v31 }
 0x321   :  { %v643_v32 = vpop.xlane.xlu0 %642 }
 0x322   :  { %v651_v34 = vsub.f32 %v616_v57, %v643_v32  ;;  %v652_v57 = vmul.f32 1.442695, %v644_v55 }
 0x324   :  { %v666_v35 = vmul.f32 1.442695, %v651_v34 }
 0x326   :  { %v3039_v39 = vpop.eup %2589  ;;  %2591 = vpow2.f32 %v666_v35 }
 0x327   :  { %v686_v40 = vsel %vm619_vm11, %v3039_v39, 0.0 }
 0x328   :  { %687 = vadd.xlane.f32.xlu2 %v686_v40 }
 0x32c   :  { %v3043_v41 = vpop.eup %2591 }
 0x32d   :  { %v689_v42 = vsel %vm619_vm11, %v3043_v41, 0.0 }
 0x32e   :  { %690 = vadd.xlane.f32.xlu0 %v689_v42 }
 0x333   :  { %v452_v43 = vpop.permute.xlu1 %451 }
 0x334   :  { %v786_v44 = vsel %vm727_vm10, %v452_v43, 0  ;;  %v448_v45 = vpop.permute.xlu0 %447 }
 0x335   :  { %v748_v46 = vsel %vm727_vm10, %v448_v45, 0  ;;  %795 = vmatpush.bf16.msrb.mxu3 %v786_v44 }
 0x336   :  { %757 = vmatpush.bf16.msrb.mxu1 %v748_v46 }
 0x340   :  { %456 = vrot.lane.b32.xlu2 %v2995_v21, %s2664_s2 }
 0x342   :  { %458 = vrot.lane.b32.xlu0 %v2995_v21, %s2663_s1 }
 0x34a   :  { %v637_v47 = vpop.xlane.xlu2 %636 }
 0x34b   :  { %v649_v48 = vsub.f32 %v578_v63, %v637_v47 }
 0x34d   :  { %v662_v50 = vmul.f32 1.442695, %v649_v48 }
 0x34f   :  { %2593 = vpow2.f32 %v662_v50 }
 0x350   :  { %2595 = vpow2.f32 %v660_v56 }
 0x351   :  { %2597 = vpow2.f32 %v652_v57 }
 0x355   :  { %v3053_v51 = vpop.eup %2593 }
 0x356   :  { %v683_v52 = vsel %vm619_vm11, %v3053_v51, 0.0  ;;  %v3061_v59 = vpop.eup %2595 }
 0x357   :  { %684 = vadd.xlane.f32.xlu1 %v683_v52  ;;  %v3063_v60 = vpop.eup %2597  ;;  %v680_v62 = vsel %vm619_vm11, %v3061_v59, 0.0 }
 0x358   :  { %v668_v25 = vsel %vm619_vm11, %v3063_v60, 0.0 }
 0x369   :  { %681 = vadd.xlane.f32.xlu2 %v680_v62 }
 0x36c   :  { %669 = vadd.xlane.f32.xlu0 %v668_v25 }
 0x370   :  { %454 = vrot.lane.b32.xlu1 %v2995_v21, %s2665_s14 }
 0x371   :  { %1041 = vadd.xlane.f32.xlu2 %v3075_v13 }
 0x374   :  { %1039 = vadd.xlane.f32.xlu0 %v3081_v22 }
 0x379   :  { %1047 = vadd.xlane.f32.xlu2 %v1046_v27 }
 0x37c   :  { %1043 = vadd.xlane.f32.xlu0 %v2959_v38 }
 0x387   :  { %v679_v33 = vpop.xlane.xlu2 %678 }
 0x388   :  { %v695_v21 = vmax.f32 %v679_v33, 1e-20  ;;  %v676_v36 = vpop.xlane.xlu0 %675 }
 0x389   :  { %v694_v63 = vmax.f32 %v676_v36, 1e-20  ;;  %v673_v0 = vpop.xlane.xlu1 %672 }
 0x38a   :  { %2599 = vrcp.f32 %v695_v21  ;;  %v693_v1 = vmax.f32 %v673_v0, 1e-20 }
 0x38b   :  { %2601 = vrcp.f32 %v694_v63 }
 0x38c   :  { %2603 = vrcp.f32 %v693_v1 }
 0x390   :  { %v2600_v19 = vpop.eup %2599 }
 0x391   :  { %v2602_v20 = vpop.eup %2601  ;;  %v711_v2 = vmul.f32 %v2600_v19, %v3026_v12 }
 0x392   :  { %v2604_v3 = vpop.eup %2603  ;;  %v710_v4 = vmul.f32 %v2602_v20, %v3029_v14 }
 0x393   :  { %v719_v5 = vpack.c.bf16 %v711_v2, %v711_v2  ;;  %v709_v6 = vmul.f32 %v2604_v3, %v3033_v17  ;;  %v2504_v2 = vld [vmem:[%s3685_s7 + $0xec] sm:$0xf]  ;;  %v2290_v3 = vld [vmem:[%s3685_s7 + $0xf8] sm:$0xf0] }
 0x394   :  { %v718_v7 = vpack.c.bf16 %v710_v4, %v710_v4  ;;  %v2500_v4 = vld [vmem:[%s3685_s7 + $0xcc] sm:$0xf] }
 0x395   :  { %v717_v8 = vpack.c.bf16 %v709_v6, %v709_v6  ;;  %2257 = vmatmul.msk.bf16.vlgmr.msrb.gmra.mxu3 %vm619_vm11, %v719_v5  ;;  %v2293_v5 = vor.u32 %v2504_v2, %v2290_v3  ;;  %v2286_v6 = vld [vmem:[%s3685_s7 + $0xd8] sm:$0xf0] }
 0x396   :  { %2256 = vmatmul.msk.bf16.vlgmr.msrb.gmra.mxu2 %vm619_vm11, %v718_v7  ;;  %v2289_v7 = vor.u32 %v2500_v4, %v2286_v6 }
 0x397   :  { %2255 = vmatmul.msk.bf16.vlgmr.msrb.gmra.mxu1 %vm619_vm11, %v717_v8  ;;  %v2496_v8 = vld [vmem:[%s3685_s7 + $0xac] sm:$0xf] }
 0x39b   :  { %v688_v9 = vpop.xlane.xlu2 %687 }
 0x39c   :  { %v698_v10 = vmax.f32 %v688_v9, 1e-20  ;;  %v2282_v9 = vld [vmem:[%s3685_s7 + $0xb8] sm:$0xf0] }
 0x39e   :  { %2605 = vrcp.f32 %v698_v10  ;;  %v2285_v10 = vor.u32 %v2496_v8, %v2282_v9  ;;  %v2538_v9 = vld [vmem:[%s3685_s7 + $0x1f4] sm:$0xf0] }
 0x3a1   :  { %v691_v11 = vpop.xlane.xlu0 %690 }
 0x3a2   :  { %v699_v17 = vmax.f32 %v691_v11, 1e-20 }
 0x3a3   :  { %v457_v18 = vpop.permute.xlu2 %456 }
 0x3a4   :  { %v2606_v12 = vpop.eup %2605  ;;  %v843_v16 = vsel %vm727_vm10, %v457_v18, 0  ;;  %2607 = vrcp.f32 %v699_v17  ;;  %v2278_v17 = vld [vmem:[%s3685_s7 + $0x98] sm:$0xf0] }
 0x3a5   :  { %v714_v14 = vmul.f32 %v2606_v12, %v3039_v39  ;;  %852 = vmatpush.bf16.msra.mxu2 %v843_v16 }
 0x3a7   :  { %v722_v23 = vpack.c.bf16 %v714_v14, %v714_v14  ;;  %v2492_v14 = vld [vmem:[%s3685_s7 + $0x8c] sm:$0xf] }
 0x3a9   :  { %2260 = vmatmul.msk.bf16.vlgmr.msra.gmra.mxu2 %vm619_vm11, %v722_v23  ;;  %v2281_v23 = vor.u32 %v2492_v14, %v2278_v17  ;;  %v2534_v17 = vld [vmem:[%s3685_s7 + $0x1d4] sm:$0xf0] }
 0x3aa   :  { %v2608_v26 = vpop.eup %2607 }
 0x3ab   :  { %v715_v28 = vmul.f32 %v2608_v26, %v3043_v41  ;;  %v2488_v26 = vld [vmem:[%s3685_s7 + $0x6c] sm:$0xf] }
 0x3ad   :  { %v723_v31 = vpack.c.bf16 %v715_v28, %v715_v28 }
 0x3b4   :  { %v459_v29 = vpop.permute.xlu0 %458 }
 0x3b5   :  { %v862_v30 = vsel %vm727_vm10, %v459_v29, 0  ;;  %v2484_v29 = vld [vmem:[%s3685_s7 + $0x4c] sm:$0xf] }
 0x3b6   :  { %871 = vmatpush.bf16.msra.mxu3 %v862_v30  ;;  %v2270_v30 = vld [vmem:[%s3685_s7 + $0x58] sm:$0xf0] }
 0x3b9   :  { %2261 = vmatmul.msk.bf16.vlgmr.msra.gmra.mxu3 %vm619_vm11, %v723_v31  ;;  %v2273_v31 = vor.u32 %v2484_v29, %v2270_v30  ;;  %v2530_v30 = vld [vmem:[%s3685_s7 + $0x1b4] sm:$0xf0] }
 0x3ca   :  { %v685_v32 = vpop.xlane.xlu1 %684 }
 0x3cb   :  { %v697_v34 = vmax.f32 %v685_v32, 1e-20  ;;  %v2480_v32 = vld [vmem:[%s3685_s7 + $0x2c] sm:$0xf] }
 0x3cd   :  { %2609 = vrcp.f32 %v697_v34  ;;  %v2266_v34 = vld [vmem:[%s3685_s7 + $0x38] sm:$0xf0] }
 0x3d3   :  { %v2610_v35 = vpop.eup %2609 }
 0x3d4   :  { %v713_v42 = vmul.f32 %v2610_v35, %v3053_v51  ;;  %v2269_v35 = vor.u32 %v2480_v32, %v2266_v34  ;;  %v2523_v32 = vld [vmem:[%s3685_s7 + $0x184] sm:$0xf]  ;;  %v2391_v34 = vld [vmem:[%s3685_s7 + $0x190] sm:$0xf0] }
 0x3d6   :  { %v721_v41 = vpack.c.bf16 %v713_v42, %v713_v42 }
 0x3dc   :  { %v682_v45 = vpop.xlane.xlu2 %681 }
 0x3dd   :  { %v696_v48 = vmax.f32 %v682_v45, 1e-20 }
 0x3df   :  { %v670_v39 = vpop.xlane.xlu0 %669 }
 0x3e0   :  { %v692_v40 = vmax.f32 %v670_v39, 1e-20  ;;  %v2476_v39 = vld [vmem:[%s3685_s7 + $0xc] sm:$0xf] }
 0x3e2   :  { %2611 = vrcp.f32 %v692_v40  ;;  %v455_v43 = vpop.permute.xlu1 %454  ;;  %v2262_v40 = vld [vmem:[%s3685_s7 + $0x18] sm:$0xf0] }
 0x3e3   :  { %v824_v44 = vsel %vm727_vm10, %v455_v43, 0  ;;  %2613 = vrcp.f32 %v696_v48  ;;  %v2265_v42 = vor.u32 %v2476_v39, %v2262_v40  ;;  %v2394_v39 = vor.u32 %v2523_v32, %v2391_v34  ;;  %v2526_v40 = vld [vmem:[%s3685_s7 + $0x194] sm:$0xf0] }
 0x3e4   :  { %833 = vmatpush.bf16.msra.mxu1 %v824_v44  ;;  %v1042_v11 = vpop.xlane.xlu2 %1041 }
 0x3e5   :  { %v1051_v18 = vmul.f32 %v1042_v11, %v2741_v15  ;;  %v2531_v11 = vld [vmem:[%s3685_s7 + $0x1c4] sm:$0xf] }
 0x3e7   :  { %2259 = vmatmul.msk.bf16.vlgmr.msra.gmra.mxu1 %vm619_vm11, %v721_v41  ;;  %v3130_v12 = vsub.f32 %v3075_v13, %v1051_v18  ;;  %v2274_v13 = vld [vmem:[%s3685_s7 + $0x78] sm:$0xf0]  ;;  %v2407_v18 = vld [vmem:[%s3685_s7 + $0x1d0] sm:$0xf0] }
 0x3e8   :  { %v2612_v46 = vpop.eup %2611  ;;  %v2277_v28 = vor.u32 %v2488_v26, %v2274_v13  ;;  %v2410_v14 = vor.u32 %v2531_v11, %v2407_v18  ;;  %v2527_v26 = vld [vmem:[%s3685_s7 + $0x1a4] sm:$0xf]  ;;  %v2399_v13 = vld [vmem:[%s3685_s7 + $0x1b0] sm:$0xf0] }
 0x3e9   :  { %v708_v47 = vmul.f32 %v2612_v46, %v3063_v60  ;;  %v2614_v52 = vpop.eup %2613  ;;  %v1061_v16 = vmul.f32 %v3130_v12, %v3130_v12  ;;  %v2402_v29 = vor.u32 %v2527_v26, %v2399_v13 }
 0x3ea   :  { %v712_v51 = vmul.f32 %v2614_v52, %v3061_v59 }
 0x3eb   :  { %v716_v50 = vpack.c.bf16 %v708_v47, %v708_v47 }
 0x3ec   :  { %v720_v54 = vpack.c.bf16 %v712_v51, %v712_v51 }
 0x3ed   :  { %2254 = vmatmul.msk.bf16.vlgmr.msrb.gmra.mxu0 %vm619_vm11, %v716_v50 }
 0x3ee   :  { %942 = vmatpush.bf16.msrb.mxu0 %v2293_v5 }
 0x3f2   :  { %943 = vmatpush.bf16.msrb.mxu0 %v2289_v7  ;;  %v2415_v7 = vld [vmem:[%s3685_s7 + $0x1f0] sm:$0xf0] }
 0x3f6   :  { %944 = vmatpush.bf16.msrb.mxu0 %v2285_v10 }
 0x3fa   :  { %945 = vmatpush.bf16.msrb.mxu0 %v2281_v23 }
 0x3fd   :  { %2258 = vmatmul.msk.bf16.vlgmr.msra.gmra.mxu0 %vm619_vm11, %v720_v54 }
 0x3fe   :  { %946 = vmatpush.bf16.msrb.mxu0 %v2277_v28  ;;  %v2405_v28 = vld [vmem:[%s3685_s7 + $0x1a8] sm:$0xf] }
 0x402   :  { %947 = vmatpush.bf16.msrb.mxu0 %v2273_v31  ;;  %v2406_v31 = vor.u32 %v2530_v30, %v2405_v28 }
 0x406   :  { %948 = vmatpush.bf16.msrb.mxu0 %v2269_v35  ;;  %v2397_v35 = vld [vmem:[%s3685_s7 + $0x188] sm:$0xf] }
 0x40a   :  { %949 = vmatpush.bf16.msrb.mxu0 %v2265_v42  ;;  %v2398_v42 = vor.u32 %v2526_v40, %v2397_v35 }
 0x414   :  { %v759_v55 = vpop.f32.mrf.mxu1 }
 0x418   :  { %v797_v56 = vpop.f32.mrf.mxu3 }
 0x419   :  { %v778_v57 = vpop.f32.mrf.mxu2 }
 0x41c   :  { %v761_v58 = vpop.f32.mrf.mxu1 }
 0x420   :  { %v799_v61 = vpop.f32.mrf.mxu3 }
 0x421   :  { %v780_v62 = vpop.f32.mrf.mxu2 }
 0x422   :  { %v1040_v62 = vpop.xlane.xlu0 %1039 }
 0x42c   :  { %v854_v25 = vpop.f32.mrf.mxu2 }
 0x42d   :  { %v2549_v49 = vpack.i.bf16 %v854_v25, %v778_v57  ;;  %v909_v25 = vperm.slane %v2910_v53, 7 }
 0x434   :  { %v856_v60 = vpop.f32.mrf.mxu2 }
 0x43c   :  { %v873_v27 = vpop.f32.mrf.mxu3 }
 0x43d   :  { %v2554_v1 = vpack.i.bf16 %v873_v27, %v797_v56 }
 0x444   :  { %v875_v33 = vpop.f32.mrf.mxu3 }
 0x464   :  { %v835_v21 = vpop.f32.mrf.mxu1 }
 0x465   :  { %v2544_v36 = vpack.i.bf16 %v835_v21, %v759_v55 }
 0x467   :  { %2545 = vrot.lane.b32.xlu1 %v2544_v36, %s2663_s1  ;;  %v1044_v36 = vpop.xlane.xlu0 %1043 }
 0x46a   :  { %v740_v63 = vpop.f32.mrf.mxu0 }
 0x46c   :  { %v837_v59 = vpop.f32.mrf.mxu1 }
 0x46d   :  { %v1050_v59 = vmul.f32 %v1040_v62, %v2741_v15  ;;  %v2511_v62 = vld [vmem:[%s3685_s7 + $0x124] sm:$0xf] }
 0x46f   :  { %2550 = vrot.lane.b32.xlu1 %v2549_v49, %s2664_s2 }
 0x472   :  { %v742_v0 = vpop.f32.mrf.mxu0 }
 0x473   :  { %v1052_v0 = vmul.f32 %v1044_v36, %v2741_v15 }
 0x477   :  { %2555 = vrot.lane.b32.xlu1 %v2554_v1, %s2665_s14 }
 0x47a   :  { %v816_v19 = vpop.f32.mrf.mxu0 }
 0x482   :  { %v818_v20 = vpop.f32.mrf.mxu0 }
 0x483   :  { %v3186_v20 = vsub.f32 %v3081_v22, %v1050_v59 }
 0x485   :  { %v1060_v3 = vmul.f32 %v3186_v20, %v3186_v20 }
 0x4a1   :  { %1037 = vadd.xlane.f32.xlu1 %v2938_v24 }
 0x4a9   :  { %1068 = vadd.xlane.f32.xlu1 %v1061_v16  ;;  %v2413_v16 = vld [vmem:[%s3685_s7 + $0x1c8] sm:$0xf] }
 0x4aa   :  { %v2414_v23 = vor.u32 %v2534_v17, %v2413_v16 }
 0x4d9   :  { %v2546_v43 = vpop.permute.xlu1 %2545 }
 0x4da   :  { %v2548_v41 = vunpack.i.h.bf16 %v2546_v43  ;;  %v2547_v45 = vunpack.i.l.bf16 %v2546_v43  ;;  %v2519_v43 = vld [vmem:[%s3685_s7 + $0x164] sm:$0xf] }
 0x4dc   :  { %v905_v50 = vsel %vm466_vm9, %v816_v19, %v2548_v41  ;;  %v889_v52 = vsel %vm466_vm9, %v740_v63, %v2547_v45  ;;  %v1048_v19 = vpop.xlane.xlu2 %1047  ;;  %v2389_v41 = vld [vmem:[%s3685_s7 + $0x168] sm:$0xf] }
 0x4dd   :  { %v1053_v2 = vmul.f32 %v1048_v19, %v2741_v15  ;;  %v2507_v19 = vld [vmem:[%s3685_s7 + $0x104] sm:$0xf] }
 0x4df   :  { %v3197_v5 = vsub.f32 %v2954_v37, %v1053_v2  ;;  %v2421_v37 = vld [vmem:[%s3685_s7 + $0x1e8] sm:$0xf]  ;;  %v2359_v2 = vld [vmem:[%s3685_s7 + $0x110] sm:$0xf0] }
 0x4e0   :  { %v2422_v10 = vor.u32 %v2538_v9, %v2421_v37 }
 0x4e1   :  { %v2551_v44 = vpop.permute.xlu1 %2550  ;;  %v1063_v22 = vmul.f32 %v3197_v5, %v3197_v5 }
 0x4e2   :  { %v2553_v46 = vunpack.i.h.bf16 %v2551_v44  ;;  %v2552_v47 = vunpack.i.l.bf16 %v2551_v44  ;;  %1324 = vmatpush.bf16.msrb.mxu3 %v2422_v10  ;;  %v2383_v44 = vld [vmem:[%s3685_s7 + $0x170] sm:$0xf0] }
 0x4e3   :  { %v1072_v6 = vsel %vm1045_vm12, %v1063_v22, 0.0  ;;  %v2386_v45 = vor.u32 %v2519_v43, %v2383_v44 }
 0x4e4   :  { %v890_v55 = vsel %vm75_vm1, %v889_v52, %v2552_v47  ;;  %v906_v56 = vsel %vm75_vm1, %v905_v50, %v2553_v46  ;;  %v2522_v46 = vld [vmem:[%s3685_s7 + $0x174] sm:$0xf0]  ;;  %v2515_v52 = vld [vmem:[%s3685_s7 + $0x144] sm:$0xf] }
 0x4e6   :  { %1325 = vmatpush.bf16.msrb.mxu3 %v2414_v23 }
 0x4e9   :  { %v2556_v48 = vpop.permute.xlu1 %2555 }
 0x4ea   :  { %v2558_v51 = vunpack.i.h.bf16 %v2556_v48  ;;  %v2557_v54 = vunpack.i.l.bf16 %v2556_v48  ;;  %1326 = vmatpush.bf16.msrb.mxu3 %v2406_v31  ;;  %v2390_v48 = vor.u32 %v2522_v46, %v2389_v41 }
 0x4ec   :  { %v892_v57 = vsel %vm891_vm13, %v890_v55, %v2557_v54  ;;  %v907_v58 = vsel %vm891_vm13, %v906_v56, %v2558_v51  ;;  %v2375_v51 = vld [vmem:[%s3685_s7 + $0x150] sm:$0xf0]  ;;  %v2381_v54 = vld [vmem:[%s3685_s7 + $0x148] sm:$0xf] }
 0x4ed   :  { %v908_v61 = vpack.c.bf16 %v907_v58, %v892_v57  ;;  %v2378_v56 = vor.u32 %v2515_v52, %v2375_v51  ;;  %v2518_v57 = vld [vmem:[%s3685_s7 + $0x154] sm:$0xf0] }
 0x4ee   :  { %1327 = vmatpush.bf16.msrb.mxu3 %v2398_v42  ;;  %v2382_v58 = vor.u32 %v2518_v57, %v2381_v54 }
 0x4ef   :  { %950 = vmatmul.bf16.vlgmr.msrb.gmra.mxu0 %v908_v61 }
 0x4f2   :  { %1328 = vmatpush.bf16.msrb.mxu3 %v2390_v48  ;;  %v3322_v48 = vld [vmem:[%s3686_s8 + $0x8] sm:$0xff] }
 0x4f3   :  { %v1140_v57 = vperm.slane %v3322_v48, 2 }
 0x4f6   :  { %1329 = vmatpush.bf16.msrb.mxu3 %v2382_v58 }
 0x514   :  { %v1038_v49 = vpop.xlane.xlu1 %1037 }
 0x515   :  { %v1049_v27 = vmul.f32 %v1038_v49, %v2741_v15  ;;  %v2373_v49 = vld [vmem:[%s3685_s7 + $0x128] sm:$0xf] }
 0x517   :  { %v3176_v21 = vsub.f32 %v2938_v24, %v1049_v27  ;;  %v3189_v24 = vsub.f32 %v2959_v38, %v1052_v0  ;;  %v2535_v38 = vld [vmem:[%s3685_s7 + $0x1e4] sm:$0xf] }
 0x518   :  { %v2418_v8 = vor.u32 %v2535_v38, %v2415_v7  ;;  %v2362_v38 = vor.u32 %v2507_v19, %v2359_v2  ;;  %v2510_v7 = vld [vmem:[%s3685_s7 + $0x114] sm:$0xf0] }
 0x519   :  { %v1059_v53 = vmul.f32 %v3176_v21, %v3176_v21  ;;  %v1062_v4 = vmul.f32 %v3189_v24, %v3189_v24 }
 0x51a   :  { %1301 = vmatpush.bf16.msrb.mxu2 %v2418_v8 }
 0x51e   :  { %1302 = vmatpush.bf16.msrb.mxu2 %v2410_v14 }
 0x522   :  { %1303 = vmatpush.bf16.msrb.mxu2 %v2402_v29 }
 0x526   :  { %1304 = vmatpush.bf16.msrb.mxu2 %v2394_v39 }
 0x52a   :  { %1305 = vmatpush.bf16.msrb.mxu2 %v2386_v45 }
 0x52e   :  { %1306 = vmatpush.bf16.msrb.mxu2 %v2378_v56 }
 0x56c   :  { %v951_v60 = vpop.f32.mrf.mxu0 }
 0x56d   :  { %v3172_v33 = vadd.f32 %v951_v60, %v909_v25  ;;  %v1069_v60 = vpop.xlane.xlu1 %1068 }
 0x56f   :  { %991 = vadd.xlane.f32.xlu0 %v3172_v33 }
 0x574   :  { %v953_v63 = vpop.f32.mrf.mxu0 }
 0x575   :  { %v3180_v1 = vadd.f32 %v953_v63, %v909_v25  ;;  %v2367_v25 = vld [vmem:[%s3685_s7 + $0x130] sm:$0xf0] }
 0x576   :  { %v2370_v27 = vor.u32 %v2511_v62, %v2367_v25 }
 0x577   :  { %993 = vadd.xlane.f32.xlu2 %v3180_v1  ;;  %1064 = vadd.xlane.f32.xlu0 %v1059_v53 }
 0x578   :  { %1307 = vmatpush.bf16.msrb.mxu2 %v2370_v27 }
 0x57c   :  { %1308 = vmatpush.bf16.msrb.mxu2 %v2362_v38 }
 0x57f   :  { %1066 = vadd.xlane.f32.xlu2 %v1060_v3  ;;  %1070 = vadd.xlane.f32.xlu0 %v1062_v4  ;;  %v2365_v3 = vld [vmem:[%s3685_s7 + $0x108] sm:$0xf]  ;;  %v1077_v4 = vmul.f32 %v1069_v60, %v2741_v15 }
 0x580   :  { %v2366_v37 = vor.u32 %v2510_v7, %v2365_v3 }
 0x581   :  { %v3312_v9 = vadd.f32 1e-05, %v1077_v4 }
 0x583   :  { %vm1111_vm11 = vweird.f32 %v3312_v9 }
 0x587   :  { %1073 = vadd.xlane.f32.xlu2 %v1072_v6 }
 0x5e2   :  { %v992_v47 = vpop.xlane.xlu0 %991 }
 0x5e3   :  { %v995_v50 = vmul.f32 %v992_v47, %v2741_v15 }
 0x5e5   :  { %v3273_v55 = vsub.f32 %v3172_v33, %v995_v50  ;;  %v2514_v33 = vld [vmem:[%s3685_s7 + $0x134] sm:$0xf0] }
 0x5e6   :  { %v2374_v59 = vor.u32 %v2514_v33, %v2373_v49  ;;  %v1146_v33 = vperm.slane %v3322_v48, 3 }
 0x5e7   :  { %v999_v61 = vmul.f32 %v3273_v55, %v3273_v55 }
 0x5e8   :  { %1330 = vmatpush.bf16.msrb.mxu3 %v2374_v59 }
 0x5e9   :  { %1001 = vadd.xlane.f32.xlu1 %v999_v61 }
 0x5ea   :  { %v994_v36 = vpop.xlane.xlu2 %993  ;;  %v1065_v63 = vpop.xlane.xlu0 %1064 }
 0x5eb   :  { %v996_v0 = vmul.f32 %v994_v36, %v2741_v15  ;;  %v1075_v53 = vmul.f32 %v1065_v63, %v2741_v15 }
 0x5ec   :  { %1331 = vmatpush.bf16.msrb.mxu3 %v2366_v37 }
 0x5ed   :  { %v3305_v22 = vsub.f32 %v3180_v1, %v996_v0  ;;  %v1080_v6 = vadd.f32 1e-05, %v1075_v53 }
 0x5ef   :  { %2615 = vrsqrt.f32 %v1080_v6  ;;  %v1000_v8 = vmul.f32 %v3305_v22, %v3305_v22  ;;  %vm1091_vm15 = vweird.f32 %v1080_v6 }
 0x5f0   :  { %2617 = vrsqrt.f32 %v3312_v9 }
 0x5f1   :  { %1003 = vadd.xlane.f32.xlu0 %v1000_v8 }
 0x5f2   :  { %v1067_v10 = vpop.xlane.xlu2 %1066  ;;  %v1071_v11 = vpop.xlane.xlu0 %1070 }
 0x5f3   :  { %v1076_v1 = vmul.f32 %v1067_v10, %v2741_v15  ;;  %v1078_v18 = vmul.f32 %v1071_v11, %v2741_v15 }
 0x5f5   :  { %v2616_v16 = vpop.eup %2615  ;;  %v1081_v14 = vadd.f32 1e-05, %v1076_v1  ;;  %v1083_v17 = vadd.f32 1e-05, %v1078_v18 }
 0x5f6   :  { %v1086_v23 = vmul.f32 %v2616_v16, %v1080_v6  ;;  %v2618_v29 = vpop.eup %2617  ;;  %vm1092_vm14 = vweird.f32 %v2616_v16 }
 0x5f7   :  { %2619 = vrsqrt.f32 %v1081_v14  ;;  %v1106_v35 = vmul.f32 %v2618_v29, %v3312_v9  ;;  %vm1093_vm0 = vmor %vm1091_vm15, %vm1092_vm14  ;;  %vm1101_vm3 = vweird.f32 %v1081_v14  ;;  %vm1112_vm6 = vweird.f32 %v2618_v29 }
 0x5f8   :  { %v1087_v26 = vmul.f32 %v2616_v16, %v1086_v23  ;;  %2621 = vrsqrt.f32 %v1083_v17  ;;  %vm1121_vm7 = vweird.f32 %v1083_v17  ;;  %vm1113_vm12 = vmor %vm1111_vm11, %vm1112_vm6  ;;  %vm1407_vm11 = vsmask.f32 7440 }
 0x5f9   :  { %v1107_v45 = vmul.f32 %v2618_v29, %v1106_v35  ;;  %v2341_v35 = vld [vmem:[%s3685_s7 + $0x160] sm:$0xf] }
 0x5fa   :  { %v1088_v13 = vmul.f32 0.5, %v1087_v26  ;;  %v1074_v28 = vpop.xlane.xlu2 %1073  ;;  %v2353_v26 = vld [vmem:[%s3685_s7 + $0x1c0] sm:$0xf] }
 0x5fb   :  { %v1079_v30 = vmul.f32 %v1074_v28, %v2741_v15  ;;  %v1108_v54 = vmul.f32 0.5, %v1107_v45  ;;  %v2349_v28 = vld [vmem:[%s3685_s7 + $0x1a0] sm:$0xf] }
 0x5fc   :  { %v1089_v31 = vsub.f32 1.5, %v1088_v13  ;;  %v2333_v45 = vld [vmem:[%s3685_s7 + $0x120] sm:$0xf] }
 0x5fd   :  { %v2620_v32 = vpop.eup %2619  ;;  %v1084_v43 = vadd.f32 1e-05, %v1079_v30  ;;  %v1109_v60 = vsub.f32 1.5, %v1108_v54 }
 0x5fe   :  { %v2622_v34 = vpop.eup %2621  ;;  %v1090_v39 = vmul.f32 %v2616_v16, %v1089_v31  ;;  %v1096_v40 = vmul.f32 %v2620_v32, %v1081_v14  ;;  %vm1102_vm2 = vweird.f32 %v2620_v32  ;;  %v2345_v31 = vld [vmem:[%s3685_s7 + $0x180] sm:$0xf] }
 0x5ff   :  { %v1116_v42 = vmul.f32 %v2622_v34, %v1083_v17  ;;  %2623 = vrsqrt.f32 %v1084_v43  ;;  %vm1103_vm4 = vmor %vm1101_vm3, %vm1102_vm2  ;;  %vm1122_vm5 = vweird.f32 %v2622_v34  ;;  %v1110_v0 = vmul.f32 %v2618_v29, %v1109_v60  ;;  %v2537_v17 = vld [vmem:[%s3685_s7 + $0x1ec] sm:$0xf0] }
 0x600   :  { %v1097_v44 = vmul.f32 %v2620_v32, %v1096_v40  ;;  %v1094_v46 = vsel %vm1093_vm0, %v2616_v16, %v1090_v39  ;;  %vm1123_vm10 = vmor %vm1121_vm7, %vm1122_vm5  ;;  %vm1131_vm15 = vweird.f32 %v1084_v43  ;;  %v2521_v39 = vld [vmem:[%s3685_s7 + $0x16c] sm:$0xf0] }
 0x601   :  { %v1117_v41 = vmul.f32 %v2622_v34, %v1116_v42  ;;  %v1135_v51 = vmul.f32 %v1094_v46, %v3176_v21  ;;  %v2342_v40 = vor.u32 %v2521_v39, %v2341_v35  ;;  %v2337_v42 = vld [vmem:[%s3685_s7 + $0x140] sm:$0xf]  ;;  %v2513_v46 = vld [vmem:[%s3685_s7 + $0x12c] sm:$0xf0] }
 0x602   :  { %v1098_v47 = vmul.f32 0.5, %v1097_v44 }
 0x603   :  { %v1118_v52 = vmul.f32 0.5, %v1117_v41  ;;  %v1141_v49 = vmul.f32 %v1140_v57, %v1135_v51  ;;  %v2509_v51 = vld [vmem:[%s3685_s7 + $0x10c] sm:$0xf0] }
 0x604   :  { %v1099_v50 = vsub.f32 1.5, %v1098_v47 }
 0x605   :  { %v1119_v61 = vsub.f32 1.5, %v1118_v52  ;;  %v2624_v62 = vpop.eup %2623  ;;  %v1147_v21 = vadd.f32 %v1146_v33, %v1141_v49  ;;  %v2329_v52 = vld [vmem:[%s3685_s7 + $0x100] sm:$0xf] }
 0x606   :  { %v1100_v56 = vmul.f32 %v2620_v32, %v1099_v50  ;;  %v1126_v63 = vmul.f32 %v2624_v62, %v1084_v43  ;;  %vm1132_vm14 = vweird.f32 %v2624_v62  ;;  %v2517_v43 = vld [vmem:[%s3685_s7 + $0x14c] sm:$0xf0]  ;;  %v2334_v50 = vor.u32 %v2513_v46, %v2333_v45 }
 0x607   :  { %v1120_v36 = vmul.f32 %v2622_v34, %v1119_v61  ;;  %vm1133_vm0 = vmor %vm1131_vm15, %vm1132_vm14  ;;  %v2338_v44 = vor.u32 %v2517_v43, %v2337_v42  ;;  %vm1738_vm14 = vcmask 138240  }
 0x608   :  { %v1104_v58 = vsel %vm1103_vm4, %v2620_v32, %v1100_v56  ;;  %v1127_v19 = vmul.f32 %v2624_v62, %v1126_v63  ;;  %v2525_v32 = vld [vmem:[%s3685_s7 + $0x18c] sm:$0xf0]  ;;  %v2330_v56 = vor.u32 %v2509_v51, %v2329_v52 }
 0x609   :  { %v1136_v25 = vmul.f32 %v1104_v58, %v3186_v20  ;;  %v1124_v2 = vsel %vm1123_vm10, %v2622_v34, %v1120_v36  ;;  %v1114_v20 = vsel %vm1113_vm12, %v2618_v29, %v1110_v0  ;;  %v2529_v29 = vld [vmem:[%s3685_s7 + $0x1ac] sm:$0xf0]  ;;  %v2346_v34 = vor.u32 %v2525_v32, %v2345_v31 }
 0x60a   :  { %v1138_v3 = vmul.f32 %v1124_v2, %v3189_v24  ;;  %v1128_v4 = vmul.f32 0.5, %v1127_v19  ;;  %v1137_v6 = vmul.f32 %v1114_v20, %v3130_v12  ;;  %v2357_v12 = vld [vmem:[%s3685_s7 + $0x1e0] sm:$0xf]  ;;  %v2350_v30 = vor.u32 %v2529_v29, %v2349_v28 }
 0x60b   :  { %v1142_v27 = vmul.f32 %v1140_v57, %v1136_v25  ;;  %v2358_v23 = vor.u32 %v2537_v17, %v2357_v12  ;;  %v3398_v17 = vperm.slane %v3322_v48, 6  ;;  %vm1406_vm10 = vsmask.f32 3328 }
 0x60c   :  { %v1144_v38 = vmul.f32 %v1140_v57, %v1138_v3  ;;  %v1129_v7 = vsub.f32 1.5, %v1128_v4  ;;  %v1143_v37 = vmul.f32 %v1140_v57, %v1137_v6  ;;  %v1034_v3 = vperm.slane %v3322_v48, 1  ;;  %vm3413_vm12 = vmor %vm1406_vm10, %vm1407_vm11 }
 0x60d   :  { %v1148_v59 = vadd.f32 %v1146_v33, %v1142_v27  ;;  %1207 = vmatpush.bf16.msrb.mxu1 %v2358_v23 }
 0x60e   :  { %v1150_v8 = vadd.f32 %v1146_v33, %v1144_v38  ;;  %v1130_v10 = vmul.f32 %v2624_v62, %v1129_v7  ;;  %v1149_v11 = vadd.f32 %v1146_v33, %v1143_v37 }
 0x60f   :  { %v1155_v53 = vpack.c.bf16 %v1148_v59, %v1147_v21 }
 0x610   :  { %v1156_v9 = vpack.c.bf16 %v1150_v8, %v1149_v11  ;;  %v1134_v1 = vsel %vm1133_vm0, %v2624_v62, %v1130_v10 }
 0x611   :  { %1309 = vmatmul.bf16.vlgmr.msrb.gmra.mxu2 %v1155_v53  ;;  %1332 = vmatmul.bf16.vlgmr.msrb.gmra.mxu3 %v1155_v53  ;;  %v1139_v18 = vmul.f32 %v1134_v1, %v3197_v5  ;;  %v2533_v5 = vld [vmem:[%s3685_s7 + $0x1cc] sm:$0xf0]  ;;  %v1031_v53 = vperm.slane %v3322_v48, 0 }
 0x612   :  { %v2354_v13 = vor.u32 %v2533_v5, %v2353_v26 }
 0x613   :  { %v1145_v16 = vmul.f32 %v1140_v57, %v1139_v18 }
 0x614   :  { %1208 = vmatpush.bf16.msrb.mxu1 %v2354_v13 }
 0x615   :  { %v1151_v24 = vadd.f32 %v1146_v33, %v1145_v16 }
 0x617   :  { %v1157_v14 = vpack.c.bf16 %v1151_v24, %v1151_v24 }
 0x618   :  { %1209 = vmatpush.bf16.msrb.mxu1 %v2350_v30 }
 0x61c   :  { %1210 = vmatpush.bf16.msrb.mxu1 %v2346_v34 }
 0x620   :  { %1211 = vmatpush.bf16.msrb.mxu1 %v2342_v40 }
 0x621   :  { %1314 = vmatmul.bf16.gmra.mxu2 %v1156_v9  ;;  %1337 = vmatmul.bf16.gmra.mxu3 %v1156_v9 }
 0x624   :  { %1212 = vmatpush.bf16.msrb.mxu1 %v2338_v44 }
 0x628   :  { %1213 = vmatpush.bf16.msrb.mxu1 %v2334_v50 }
 0x62c   :  { %1214 = vmatpush.bf16.msrb.mxu1 %v2330_v56 }
 0x631   :  { %1319 = vmatmul.bf16.gmra.mxu2 %v1157_v14  ;;  %1342 = vmatmul.bf16.gmra.mxu3 %v1157_v14 }
 0x65c   :  { %v1002_v41 = vpop.xlane.xlu1 %1001 }
 0x65d   :  { %v1005_v47 = vmul.f32 %v1002_v41, %v2741_v15 }
 0x65f   :  { %v1007_v54 = vadd.f32 1e-05, %v1005_v47 }
 0x661   :  { %2625 = vrsqrt.f32 %v1007_v54  ;;  %vm1015_vm3 = vweird.f32 %v1007_v54 }
 0x664   :  { %v1004_v57 = vpop.xlane.xlu0 %1003 }
 0x665   :  { %v1006_v58 = vmul.f32 %v1004_v57, %v2741_v15 }
 0x667   :  { %v2626_v61 = vpop.eup %2625  ;;  %v1008_v62 = vadd.f32 1e-05, %v1006_v58 }
 0x668   :  { %v1010_v25 = vmul.f32 %v2626_v61, %v1007_v54  ;;  %vm1016_vm2 = vweird.f32 %v2626_v61 }
 0x669   :  { %2627 = vrsqrt.f32 %v1008_v62  ;;  %vm1017_vm4 = vmor %vm1015_vm3, %vm1016_vm2  ;;  %vm1025_vm6 = vweird.f32 %v1008_v62 }
 0x66a   :  { %v1011_v49 = vmul.f32 %v2626_v61, %v1010_v25 }
 0x66c   :  { %v1012_v60 = vmul.f32 0.5, %v1011_v49 }
 0x66e   :  { %v1013_v27 = vsub.f32 1.5, %v1012_v60 }
 0x66f   :  { %v2628_v33 = vpop.eup %2627 }
 0x670   :  { %v1014_v36 = vmul.f32 %v2626_v61, %v1013_v27  ;;  %v1020_v63 = vmul.f32 %v2628_v33, %v1008_v62  ;;  %vm1026_vm5 = vweird.f32 %v2628_v33 }
 0x671   :  { %vm1027_vm7 = vmor %vm1025_vm6, %vm1026_vm5 }
 0x672   :  { %v1018_v21 = vsel %vm1017_vm4, %v2626_v61, %v1014_v36  ;;  %v1021_v59 = vmul.f32 %v2628_v33, %v1020_v63 }
 0x673   :  { %v1029_v15 = vmul.f32 %v1018_v21, %v3273_v55  ;;  %v1347_v55 = vperm.slane %v3322_v48, 5 }
 0x674   :  { %v1022_v0 = vmul.f32 0.5, %v1021_v59 }
 0x675   :  { %v1032_v20 = vmul.f32 %v1031_v53, %v1029_v15 }
 0x676   :  { %v1023_v19 = vsub.f32 1.5, %v1022_v0 }
 0x677   :  { %v1035_v7 = vadd.f32 %v1034_v3, %v1032_v20 }
 0x678   :  { %v1024_v2 = vmul.f32 %v2628_v33, %v1023_v19 }
 0x679   :  { %v1152_v8 = vmul.f32 0.17677669, %v1035_v7 }
 0x67a   :  { %v1028_v4 = vsel %vm1027_vm7, %v2628_v33, %v1024_v2 }
 0x67b   :  { %v1030_v6 = vmul.f32 %v1028_v4, %v3305_v22 }
 0x67d   :  { %v1033_v38 = vmul.f32 %v1031_v53, %v1030_v6 }
 0x67f   :  { %v1036_v37 = vadd.f32 %v1034_v3, %v1033_v38 }
 0x681   :  { %v1153_v10 = vmul.f32 0.17677669, %v1036_v37 }
 0x683   :  { %v1154_v11 = vpack.c.bf16 %v1153_v10, %v1152_v8 }
 0x685   :  { %1215 = vmatmul.bf16.vlgmr.msrb.gmra.mxu1 %v1154_v11 }
 0x694   :  { %v1310_v9 = vpop.f32.mrf.mxu2  ;;  %v3387_v1 = vpop.f32.mrf.mxu3 }
 0x695   :  { %v1348_v18 = vadd.f32 %v1347_v55, %v1310_v9 }
 0x697   :  { %v1361_v16 = vpack.c.bf16 %v1348_v18, %v1348_v18 }
 0x699   :  { %1388 = vrot.lane.b32.xlu1 %v1361_v16, %s2665_s14  ;;  %v1522_v46 = vunpack.c.l.b16 %v1361_v16 }
 0x69c   :  { %v1312_v24 = vpop.f32.mrf.mxu2  ;;  %v3390_v14 = vpop.f32.mrf.mxu3 }
 0x69d   :  { %v1349_v22 = vadd.f32 %v1347_v55, %v1312_v24 }
 0x69f   :  { %v3392_v12 = vpack.c.bf16 %v1349_v22, %v1349_v22 }
 0x6a1   :  { %1400 = vrot.lane.b32.xlu1 %v1361_v16, %s2663_s1  ;;  %1390 = vrot.lane.b32.xlu0 %v3392_v12, %s2665_s14  ;;  %v1523_v41 = vunpack.c.l.b16 %v3392_v12 }
 0x6a3   :  { %v1525_v54 = vpack.c.b16 %v1523_v41, %v1522_v46 }
 0x6a4   :  { %v1315_v23 = vpop.f32.mrf.mxu2  ;;  %v1338_v26 = vpop.f32.mrf.mxu3 }
 0x6a5   :  { %v1350_v5 = vadd.f32 %v1347_v55, %v1315_v23  ;;  %v1356_v13 = vadd.f32 %v3398_v17, %v1338_v26  ;;  %v1531_v33 = vsel %vm466_vm9, %v1525_v54, 0 }
 0x6a7   :  { %v1363_v28 = vpack.c.bf16 %v1350_v5, %v1350_v5  ;;  %v3401_v29 = vpack.c.bf16 %v1356_v13, %v1356_v13 }
 0x6a9   :  { %1404 = vrot.lane.b32.xlu0 %v1363_v28, %s2663_s1  ;;  %1392 = vrot.lane.b32.xlu2 %v1363_v28, %s2665_s14  ;;  %v1524_v30 = vunpack.c.l.b16 %v1363_v28  ;;  %v1477_v31 = vshrl.u32 %v3401_v29, 16  ;;  %v1480_v32 = vshll.u32 %v3401_v29, 16  ;;  %v1410_v2 = vshrl.u32 %v1363_v28, 16 }
 0x6aa   :  { %v1413_v20 = vshll.u32 %v1363_v28, 16 }
 0x6ab   :  { %v1526_v34 = vpack.c.b16 %v1524_v30, %v1524_v30  ;;  %v1479_v40 = vrot.slane %v1477_v31, 4  ;;  %v1482_v42 = vrot.slane %v1480_v32, 5  ;;  %v1412_v9 = vrot.slane %v1410_v2, 4 }
 0x6ac   :  { %v1317_v35 = vpop.f32.mrf.mxu2  ;;  %v1340_v39 = vpop.f32.mrf.mxu3  ;;  %v1415_v18 = vrot.slane %v1413_v20, 5 }
 0x6ad   :  { %v1357_v43 = vadd.f32 %v3398_v17, %v1340_v39  ;;  %v1534_v44 = vsel %vm466_vm9, %v1526_v34, 0  ;;  %v1351_v47 = vadd.f32 %v1347_v55, %v1317_v35  ;;  %v1483_v50 = vor.u32 %v1482_v42, %v1479_v40 }
 0x6ae   :  { %1542 = vmatpush.bf16.xpose.msra.mxu0 %v1534_v44  ;;  %v1416_v22 = vor.u32 %v1415_v18, %v1412_v9  ;;  %v1355_v9 = vadd.f32 %v3398_v17, %v3390_v14 }
 0x6af   :  { %v1369_v45 = vpack.c.bf16 %v1357_v43, %v1357_v43  ;;  %v1364_v61 = vpack.c.bf16 %v1351_v47, %v1351_v47  ;;  %v1484_v49 = vrot.slane %v1483_v50, 4 }
 0x6b0   :  { %v1417_v5 = vrot.slane %v1416_v22, 4 }
 0x6b1   :  { %v1486_v52 = vshll.u32 %v1369_v45, 16  ;;  %v1490_v51 = vshrl.u32 %v1369_v45, 16  ;;  %1396 = vrot.lane.b32.xlu0 %v3392_v12, %s2664_s2  ;;  %1398 = vrot.lane.b32.xlu2 %v1363_v28, %s2664_s2  ;;  %v1419_v0 = vshll.u32 %v1364_v61, 16  ;;  %v1423_v53 = vshrl.u32 %v1364_v61, 16 }
 0x6b3   :  { %v1488_v56 = vrot.slane %v1486_v52, 5  ;;  %v1492_v57 = vrot.slane %v1490_v51, 4  ;;  %v1421_v38 = vrot.slane %v1419_v0, 5  ;;  %v1425_v7 = vrot.slane %v1423_v53, 4 }
 0x6b4   :  { %v1320_v62 = vpop.f32.mrf.mxu2  ;;  %v1343_v25 = vpop.f32.mrf.mxu3 }
 0x6b5   :  { %v1352_v60 = vadd.f32 %v1347_v55, %v1320_v62  ;;  %v1358_v27 = vadd.f32 %v3398_v17, %v1343_v25  ;;  %v3421_v36 = vsel %vm3413_vm12, %v1484_v49, %v1488_v56  ;;  %v1493_v63 = vor.u32 %v1492_v57, %v1488_v56 }
 0x6b6   :  { %1543 = vmatpush.bf16.xpose.msra.mxu0 %v1531_v33  ;;  %v3447_v13 = vsel %vm3413_vm12, %v1417_v5, %v1421_v38  ;;  %v1354_v56 = vadd.f32 %v3398_v17, %v3387_v1 }
 0x6b7   :  { %v1365_v21 = vpack.c.bf16 %v1352_v60, %v1352_v60  ;;  %v3423_v59 = vpack.c.bf16 %v1358_v27, %v1358_v27  ;;  %v1494_v3 = vrot.slane %v1493_v63, 4 }
 0x6b8   :  { %v3477_v61 = vpack.c.bf16 %v1354_v56, %v1354_v56 }
 0x6b9   :  { %v1433_v15 = vshrl.u32 %v1365_v21, 16  ;;  %v1496_v19 = vshll.u32 %v3423_v59, 16  ;;  %1394 = vrot.lane.b32.xlu2 %v1361_v16, %s2664_s2  ;;  %v1429_v55 = vshll.u32 %v1365_v21, 16  ;;  %v1426_v16 = vor.u32 %v1425_v7, %v1421_v38 }
 0x6ba   :  { %v1500_v62 = vshrl.u32 %v3423_v59, 16 }
 0x6bb   :  { %v1435_v4 = vrot.slane %v1433_v15, 4  ;;  %v1498_v6 = vrot.slane %v1496_v19, 5  ;;  %v1431_v24 = vrot.slane %v1429_v55, 5  ;;  %v1427_v23 = vrot.slane %v1426_v16, 4 }
 0x6bc   :  { %v1322_v37 = vpop.f32.mrf.mxu2  ;;  %v1345_v8 = vpop.f32.mrf.mxu3  ;;  %v1502_v1 = vrot.slane %v1500_v62, 4 }
 0x6bd   :  { %v3427_v10 = vrot.slane %v1435_v4, 4  ;;  %v3431_v11 = vsel %vm3413_vm12, %v1494_v3, %v1498_v6  ;;  %v3441_v26 = vsel %vm3413_vm12, %v1427_v23, %v1431_v24  ;;  %v1630_v37 = vunpack.c.l.b16 %v3447_v13 }
 0x6be   :  { %v3488_v53 = vrot.slane %v1502_v1, 4  ;;  %v1631_v7 = vunpack.c.l.b16 %v3441_v26 }
 0x6bf   :  { %1453 = vrot.lane.b32.xlu1 %v3427_v10, %s2663_s1  ;;  %1447 = vrot.lane.b32.xlu0 %v3427_v10, %s2664_s2  ;;  %v1632_v21 = vunpack.c.l.b16 %v3427_v10 }
 0x6c0   :  { %v1633_v8 = vpack.c.b16 %v1631_v7, %v1630_v37 }
 0x6c1   :  { %1402 = vrot.lane.b32.xlu2 %v3392_v12, %s2663_s1  ;;  %v1158_v12 = vperm.slane %v3322_v48, 4  ;;  %v1634_v20 = vpack.c.b16 %v1632_v21, %v1632_v21  ;;  %v1946_v21 = vunpack.c.l.b16 %v3431_v11 }
 0x6c2   :  { %v1639_v24 = vsel %vm466_vm9, %v1633_v8, 0 }
 0x6c3   :  { %v1642_v38 = vsel %vm466_vm9, %v1634_v20, 0 }
 0x6c7   :  { %1445 = vrot.lane.b32.xlu0 %v3441_v26, %s2664_s2 }
 0x6c9   :  { %1443 = vrot.lane.b32.xlu2 %v3447_v13, %s2664_s2 }
 0x6d1   :  { %1451 = vrot.lane.b32.xlu2 %v3441_v26, %s2663_s1 }
 0x6d9   :  { %1441 = vrot.lane.b32.xlu2 %v3427_v10, %s2665_s14 }
 0x702   :  { %v1216_v28 = vpop.f32.mrf.mxu1 }
 0x703   :  { %v1217_v30 = vadd.f32 %v1216_v28, %v1158_v12  ;;  %v1393_v31 = vpop.permute.xlu2 %1392 }
 0x704   :  { %v1551_v32 = vunpack.c.l.b16 %v1393_v31 }
 0x705   :  { %v1359_v34 = vpack.c.bf16 %v1217_v30, %v1217_v30 }
 0x706   :  { %v1553_v35 = vpack.c.b16 %v1551_v32, %v1551_v32 }
 0x707   :  { %1374 = vrot.lane.b32.xlu0 %v1359_v34, %s2664_s2  ;;  %1372 = vrot.lane.b32.xlu1 %v1359_v34, %s2665_s14 }
 0x708   :  { %v1561_v39 = vsel %vm466_vm9, %v1553_v35, 0  ;;  %2423 = vmatmul.msk.bf16.vlgmr.msra.gmra.mxu0 %vm466_vm9, %v1359_v34 }
 0x709   :  { %1569 = vmatpush.bf16.xpose.msra.mxu1 %v1561_v39 }
 0x70a   :  { %v1218_v40 = vpop.f32.mrf.mxu1 }
 0x70b   :  { %v1219_v42 = vadd.f32 %v1218_v40, %v1158_v12  ;;  %v1399_v43 = vpop.permute.xlu2 %1398  ;;  %v1389_v46 = vpop.permute.xlu1 %1388  ;;  %v1845_v40 = vunpack.c.l.b16 %v3401_v29 }
 0x70c   :  { %v1578_v44 = vunpack.c.l.b16 %v1399_v43  ;;  %v1549_v52 = vunpack.c.l.b16 %v1389_v46 }
 0x70d   :  { %v3460_v48 = vpack.c.bf16 %v1219_v42, %v1219_v42  ;;  %v1847_v43 = vpack.c.b16 %v1845_v40, %v1845_v40 }
 0x70e   :  { %v1580_v41 = vpack.c.b16 %v1578_v44, %v1578_v44  ;;  %v2666_v44 = vmov 0  }
 0x70f   :  { %1381 = vrot.lane.b32.xlu2 %v3460_v48, %s2664_s2  ;;  %1437 = vrot.lane.b32.xlu0 %v3447_v13, %s2665_s14 }
 0x710   :  { %v1588_v45 = vsel %vm466_vm9, %v1580_v41, 0  ;;  %1449 = vrot.lane.b32.xlu1 %v3447_v13, %s2663_s1  ;;  %v3521_v41 = vsel %vm108_vm8, 65535, %v2666_v44 }
 0x711   :  { %1596 = vmatpush.bf16.xpose.msrb.mxu0 %v1588_v45 }
 0x713   :  { %v1395_v47 = vpop.permute.xlu2 %1394  ;;  %v1391_v50 = vpop.permute.xlu0 %1390 }
 0x714   :  { %v1550_v51 = vunpack.c.l.b16 %v1391_v50  ;;  %v1401_v27 = vpop.permute.xlu1 %1400  ;;  %v1576_v15 = vunpack.c.l.b16 %v1395_v47  ;;  %v1855_v50 = vand.u32 %v3521_v41, %v1847_v43 }
 0x715   :  { %v1603_v59 = vunpack.c.l.b16 %v1401_v27 }
 0x716   :  { %v1552_v54 = vpack.c.b16 %v1550_v51, %v1549_v52 }
 0x717   :  { %1462 = vrot.lane.b32.xlu2 %v3401_v29, %s2665_s14  ;;  %1383 = vrot.lane.b32.xlu0 %v3460_v48, %s2663_s1 }
 0x718   :  { %1376 = vrot.lane.b32.xlu1 %v1359_v34, %s2663_s1  ;;  %v1558_v57 = vsel %vm466_vm9, %v1552_v54, 0 }
 0x719   :  { %1570 = vmatpush.bf16.xpose.msra.mxu1 %v1558_v57  ;;  %v1947_v57 = vunpack.c.l.b16 %v3488_v53 }
 0x71b   :  { %v1405_v58 = vpop.permute.xlu0 %1404  ;;  %v1403_v49 = vpop.permute.xlu2 %1402  ;;  %v1949_v27 = vpack.c.b16 %v1947_v57, %v1947_v57 }
 0x71c   :  { %v1605_v25 = vunpack.c.l.b16 %v1405_v58  ;;  %v1604_v33 = vunpack.c.l.b16 %v1403_v49 }
 0x71e   :  { %v1607_v60 = vpack.c.b16 %v1605_v25, %v1605_v25  ;;  %v1606_v19 = vpack.c.b16 %v1604_v33, %v1603_v59 }
 0x71f   :  { %1458 = vrot.lane.b32.xlu2 %v3477_v61, %s2665_s14  ;;  %1474 = vrot.lane.b32.xlu0 %v3401_v29, %s2663_s1 }
 0x720   :  { %1439 = vrot.lane.b32.xlu1 %v3441_v26, %s2665_s14  ;;  %v1615_v63 = vsel %vm466_vm9, %v1607_v60, 0  ;;  %v1612_v6 = vsel %vm466_vm9, %v1606_v19, 0  ;;  %v1367_v26 = vpack.c.bf16 %v1355_v9, %v1355_v9 }
 0x721   :  { %1623 = vmatpush.bf16.xpose.msrb.mxu1 %v1615_v63  ;;  %v1955_v63 = vand.u32 %v1949_v27, %v3521_v41 }
 0x722   :  { %v1844_v52 = vunpack.c.l.b16 %v1367_v26 }
 0x723   :  { %v1397_v0 = vpop.permute.xlu0 %1396  ;;  %v1444_v12 = vpop.permute.xlu2 %1443 }
 0x724   :  { %v1577_v2 = vunpack.c.l.b16 %v1397_v0  ;;  %v1684_v17 = vunpack.c.l.b16 %v1444_v12  ;;  %v1945_v0 = vunpack.c.l.b16 %v3421_v36 }
 0x726   :  { %v1579_v3 = vpack.c.b16 %v1577_v2, %v1576_v15  ;;  %v1948_v15 = vpack.c.b16 %v1946_v21, %v1945_v0 }
 0x727   :  { %1508 = vrot.lane.b32.xlu2 %v3488_v53, %s2665_s14  ;;  %1464 = vrot.lane.b32.xlu0 %v3477_v61, %s2664_s2 }
 0x728   :  { %1379 = vrot.lane.b32.xlu1 %v3460_v48, %s2665_s14  ;;  %v1585_v4 = vsel %vm466_vm9, %v1579_v3, 0 }
 0x729   :  { %1597 = vmatpush.bf16.xpose.msrb.mxu0 %v1585_v4  ;;  %1624 = vmatpush.bf16.xpose.msrb.mxu1 %v1612_v6 }
 0x72b   :  { %v1452_v32 = vpop.permute.xlu2 %1451 }
 0x72c   :  { %v1712_v58 = vunpack.c.l.b16 %v1452_v32 }
 0x72f   :  { %1470 = vrot.lane.b32.xlu0 %v3477_v61, %s2663_s1 }
 0x730   :  { %1468 = vrot.lane.b32.xlu1 %v3401_v29, %s2664_s2  ;;  %v1843_v29 = vunpack.c.l.b16 %v3477_v61 }
 0x731   :  { %1650 = vmatpush.bf16.xpose.msra.mxu0 %v1642_v38  ;;  %v1454_v10 = vpop.permute.xlu1 %1453  ;;  %v1448_v55 = vpop.permute.xlu0 %1447 }
 0x732   :  { %v1713_v18 = vunpack.c.l.b16 %v1454_v10  ;;  %v1686_v16 = vunpack.c.l.b16 %v1448_v55  ;;  %v1846_v51 = vpack.c.b16 %v1844_v52, %v1843_v29 }
 0x733   :  { %v1442_v34 = vpop.permute.xlu2 %1441 }
 0x734   :  { %v1715_v22 = vpack.c.b16 %v1713_v18, %v1713_v18  ;;  %v1688_v23 = vpack.c.b16 %v1686_v16, %v1686_v16  ;;  %v1659_v39 = vunpack.c.l.b16 %v1442_v34 }
 0x736   :  { %v1723_v5 = vsel %vm466_vm9, %v1715_v22, 0  ;;  %v1696_v13 = vsel %vm466_vm9, %v1688_v23, 0  ;;  %v1661_v42 = vpack.c.b16 %v1659_v39, %v1659_v39 }
 0x737   :  { %1731 = vmatpush.bf16.xpose.msra.mxu3 %v1723_v5  ;;  %1520 = vrot.lane.b32.xlu0 %v3488_v53, %s2663_s1 }
 0x738   :  { %1466 = vrot.lane.b32.xlu1 %v1367_v26, %s2664_s2  ;;  %1704 = vmatpush.bf16.xpose.msra.mxu2 %v1696_v13  ;;  %v1669_v46 = vsel %vm466_vm9, %v1661_v42, 0 }
 0x739   :  { %1651 = vmatpush.bf16.xpose.msra.mxu0 %v1639_v24  ;;  %v1446_v14 = vpop.permute.xlu0 %1445 }
 0x73a   :  { %v1685_v28 = vunpack.c.l.b16 %v1446_v14 }
 0x73c   :  { %v1687_v30 = vpack.c.b16 %v1685_v28, %v1684_v17 }
 0x73e   :  { %v1693_v31 = vsel %vm466_vm9, %v1687_v30, 0 }
 0x740   :  { %1472 = vrot.lane.b32.xlu1 %v1367_v26, %s2663_s1  ;;  %1705 = vmatpush.bf16.xpose.msra.mxu2 %v1693_v31 }
 0x748   :  { %1460 = vrot.lane.b32.xlu1 %v1367_v26, %s2665_s14 }
 0x750   :  { %1514 = vrot.lane.b32.xlu1 %v3488_v53, %s2664_s2 }
 0x769   :  { %v1382_v35 = vpop.permute.xlu2 %1381 }
 0x76a   :  { %2429 = vmatmul.msk.bf16.vlgmr.msra.gmra.mxu2 %vm466_vm9, %v1382_v35 }
 0x771   :  { %v1463_v59 = vpop.permute.xlu2 %1462 }
 0x772   :  { %v1872_v19 = vunpack.c.l.b16 %v1463_v59 }
 0x774   :  { %v1874_v3 = vpack.c.b16 %v1872_v19, %v1872_v19 }
 0x779   :  { %v1373_v45 = vpop.permute.xlu1 %1372  ;;  %v1375_v47 = vpop.permute.xlu0 %1374 }
 0x77a   :  { %2424 = vmatmul.msk.bf16.vlgmr.msra.gmra.mxu1 %vm466_vm9, %v1373_v45  ;;  %2425 = vmatmul.msk.bf16.vlgmr.msrb.gmra.mxu0 %vm466_vm9, %v1375_v47  ;;  %v1459_v26 = vpop.permute.xlu2 %1458 }
 0x77b   :  { %1677 = vmatpush.bf16.xpose.msra.mxu1 %v1669_v46  ;;  %1863 = vmatpush.bf16.msrb.mxu0 %v1855_v50  ;;  %v1870_v45 = vunpack.c.l.b16 %v1459_v26 }
 0x77f   :  { %1864 = vmatpush.bf16.msrb.mxu0 %v1846_v51 }
 0x781   :  { %v1438_v56 = vpop.permute.xlu0 %1437 }
 0x782   :  { %v1450_v54 = vpop.permute.xlu1 %1449  ;;  %v1657_v4 = vunpack.c.l.b16 %v1438_v56  ;;  %v1509_v32 = vpop.permute.xlu2 %1508 }
 0x783   :  { %v1711_v62 = vunpack.c.l.b16 %v1450_v54  ;;  %v1972_v40 = vunpack.c.l.b16 %v1509_v32 }
 0x785   :  { %v1714_v25 = vpack.c.b16 %v1712_v58, %v1711_v62  ;;  %v3529_v49 = vpop.f32.mrf.mxu0  ;;  %v1974_v43 = vpack.c.b16 %v1972_v40, %v1972_v40 }
 0x786   :  { %v1739_v60 = vsel %vm1738_vm14, %v3529_v49, -inf }
 0x787   :  { %1740 = vmax.xlane.f32.xlu2 %v1739_v60  ;;  %v1720_v1 = vsel %vm466_vm9, %v1714_v25, 0  ;;  %v1980_v50 = vand.u32 %v1974_v43, %v3521_v41 }
 0x788   :  { %1732 = vmatpush.bf16.xpose.msra.mxu3 %v1720_v1 }
 0x789   :  { %v1384_v33 = vpop.permute.xlu0 %1383 }
 0x78a   :  { %v1377_v61 = vpop.permute.xlu1 %1376  ;;  %2427 = vmatmul.msk.bf16.vlgmr.msra.gmra.mxu0 %vm466_vm9, %v3460_v48  ;;  %v1880_v48 = vand.u32 %v1874_v3, %v3521_v41 }
 0x78b   :  { %2426 = vmatmul.msk.bf16.vlgmr.msrb.gmra.mxu1 %vm466_vm9, %v1377_v61  ;;  %1963 = vmatpush.bf16.msra.mxu0 %v1955_v63 }
 0x78d   :  { %v1547_v53 = vpop.f32.mrf.mxu0 }
 0x78f   :  { %2430 = vmatmul.msk.bf16.vlgmr.msra.gmra.mxu3 %vm466_vm9, %v1384_v33  ;;  %1964 = vmatpush.bf16.msra.mxu0 %v1948_v15 }
 0x791   :  { %v1475_v20 = vpop.permute.xlu0 %1474 }
 0x792   :  { %v1440_v2 = vpop.permute.xlu1 %1439  ;;  %v1922_v38 = vunpack.c.l.b16 %v1475_v20 }
 0x793   :  { %v1658_v6 = vunpack.c.l.b16 %v1440_v2 }
 0x794   :  { %v1924_v37 = vpack.c.b16 %v1922_v38, %v1922_v38 }
 0x795   :  { %v1660_v7 = vpack.c.b16 %v1658_v6, %v1657_v4 }
 0x796   :  { %v1930_v8 = vand.u32 %v1924_v37, %v3521_v41 }
 0x797   :  { %v1666_v10 = vsel %vm466_vm9, %v1660_v7, 0 }
 0x798   :  { %1678 = vmatpush.bf16.xpose.msra.mxu1 %v1666_v10  ;;  %1938 = vmatpush.bf16.msrb.mxu3 %v1930_v8 }
 0x799   :  { %v1465_v9 = vpop.permute.xlu0 %1464 }
 0x79a   :  { %v1380_v55 = vpop.permute.xlu1 %1379  ;;  %v1895_v13 = vunpack.c.l.b16 %v1465_v9 }
 0x79f   :  { %2428 = vmatmul.msk.bf16.vlgmr.msra.gmra.mxu1 %vm466_vm9, %v1380_v55 }
 0x7a0   :  { %1888 = vmatpush.bf16.msrb.mxu1 %v1880_v48 }
 0x7a1   :  { %v1471_v16 = vpop.permute.xlu0 %1470 }
 0x7a2   :  { %v1469_v18 = vpop.permute.xlu1 %1468  ;;  %v1920_v34 = vunpack.c.l.b16 %v1471_v16 }
 0x7a3   :  { %v1897_v24 = vunpack.c.l.b16 %v1469_v18 }
 0x7a5   :  { %v1899_v22 = vpack.c.b16 %v1897_v24, %v1897_v24 }
 0x7a7   :  { %v1905_v23 = vand.u32 %v1899_v22, %v3521_v41 }
 0x7a9   :  { %1913 = vmatpush.bf16.msrb.mxu2 %v1905_v23  ;;  %v1521_v14 = vpop.permute.xlu0 %1520 }
 0x7aa   :  { %v1467_v5 = vpop.permute.xlu1 %1466  ;;  %v2022_v28 = vunpack.c.l.b16 %v1521_v14 }
 0x7ab   :  { %v1896_v12 = vunpack.c.l.b16 %v1467_v5 }
 0x7ac   :  { %v2024_v30 = vpack.c.b16 %v2022_v28, %v2022_v28 }
 0x7ad   :  { %v1898_v17 = vpack.c.b16 %v1896_v12, %v1895_v13 }
 0x7ae   :  { %v2030_v42 = vand.u32 %v2024_v30, %v3521_v41 }
 0x7af   :  { %1914 = vmatpush.bf16.msrb.mxu2 %v1898_v17 }
 0x7b2   :  { %v1473_v31 = vpop.permute.xlu1 %1472 }
 0x7b3   :  { %v1921_v35 = vunpack.c.l.b16 %v1473_v31 }
 0x7b5   :  { %v1923_v39 = vpack.c.b16 %v1921_v35, %v1920_v34 }
 0x7b7   :  { %1939 = vmatpush.bf16.msrb.mxu3 %v1923_v39 }
 0x7ba   :  { %v1461_v44 = vpop.permute.xlu1 %1460 }
 0x7bb   :  { %2038 = vmatpush.bf16.msra.mxu3 %v2030_v42  ;;  %v1871_v46 = vunpack.c.l.b16 %v1461_v44 }
 0x7bd   :  { %v1873_v47 = vpack.c.b16 %v1871_v46, %v1870_v45 }
 0x7bf   :  { %1889 = vmatpush.bf16.msrb.mxu1 %v1873_v47 }
 0x7c2   :  { %v1515_v52 = vpop.permute.xlu1 %1514 }
 0x7c3   :  { %1988 = vmatpush.bf16.msra.mxu1 %v1980_v50  ;;  %v1997_v29 = vunpack.c.l.b16 %v1515_v52 }
 0x7c5   :  { %v1999_v51 = vpack.c.b16 %v1997_v29, %v1997_v29 }
 0x7c7   :  { %v2005_v54 = vand.u32 %v1999_v51, %v3521_v41 }
 0x7c9   :  { %2013 = vmatpush.bf16.msra.mxu2 %v2005_v54 }
 0x7ed   :  { %v1707_v56 = vpop.f32.mrf.mxu2 }
 0x7ee   :  { %v1757_v61 = vsel %vm1738_vm14, %v1707_v56, -inf }
 0x7f5   :  { %v1709_v57 = vpop.f32.mrf.mxu2 }
 0x7f7   :  { %v1572_v58 = vpop.f32.mrf.mxu1  ;;  %v1599_v62 = vpop.f32.mrf.mxu0 }
 0x7f8   :  { %v1742_v25 = vsel %vm1738_vm14, %v1572_v58, -inf  ;;  %v1745_v60 = vsel %vm1738_vm14, %v1599_v62, -inf }
 0x7f9   :  { %1743 = vmax.xlane.f32.xlu1 %v1742_v25  ;;  %1746 = vmax.xlane.f32.xlu2 %v1745_v60 }
 0x7fa   :  { %v1741_v4 = vpop.xlane.xlu2 %1740 }
 0x7fb   :  { %v1763_v45 = vsub.f32 %v3529_v49, %v1741_v4 }
 0x7fd   :  { %v1771_v47 = vmul.f32 1.442695, %v1763_v45 }
 0x7ff   :  { %v1574_v27 = vpop.f32.mrf.mxu1  ;;  %v1601_v1 = vpop.f32.mrf.mxu0 }
 0x801   :  { %1758 = vmax.xlane.f32.xlu2 %v1757_v61 }
 0x807   :  { %v3552_v63 = vpop.f32.mrf.mxu0 }
 0x808   :  { %v1626_v33 = vpop.f32.mrf.mxu1  ;;  %v1751_v20 = vsel %vm1738_vm14, %v3552_v63, -inf }
 0x809   :  { %v1748_v15 = vsel %vm1738_vm14, %v1626_v33, -inf }
 0x80f   :  { %v1655_v21 = vpop.f32.mrf.mxu0 }
 0x810   :  { %v1628_v41 = vpop.f32.mrf.mxu1 }
 0x812   :  { %v1734_v59 = vpop.f32.mrf.mxu3 }
 0x813   :  { %v1760_v0 = vsel %vm1738_vm14, %v1734_v59, -inf }
 0x814   :  { %1761 = vmax.xlane.f32.xlu0 %v1760_v0 }
 0x81a   :  { %v1736_v53 = vpop.f32.mrf.mxu3 }
 0x81c   :  { %v1680_v19 = vpop.f32.mrf.mxu1  ;;  %1749 = vmax.xlane.f32.xlu0 %v1748_v15 }
 0x81d   :  { %v1754_v2 = vsel %vm1738_vm14, %v1680_v19, -inf }
 0x81e   :  { %1755 = vmax.xlane.f32.xlu1 %v1754_v2 }
 0x824   :  { %v1682_v3 = vpop.f32.mrf.mxu1  ;;  %1752 = vmax.xlane.f32.xlu0 %v1751_v20 }
 0x837   :  { %1510 = vrot.lane.b32.xlu1 %v3421_v36, %s2664_s2 }
 0x838   :  { %1512 = vrot.lane.b32.xlu0 %v3431_v11, %s2664_s2 }
 0x840   :  { %1516 = vrot.lane.b32.xlu0 %v3421_v36, %s2663_s1 }
 0x86c   :  { %v1744_v6 = vpop.xlane.xlu1 %1743  ;;  %v1747_v7 = vpop.xlane.xlu2 %1746 }
 0x86d   :  { %v1764_v38 = vsub.f32 %v1572_v58, %v1744_v6  ;;  %v1765_v37 = vsub.f32 %v1599_v62, %v1747_v7 }
 0x86f   :  { %v1773_v48 = vmul.f32 1.442695, %v1764_v38  ;;  %v1775_v8 = vmul.f32 1.442695, %v1765_v37 }
 0x871   :  { %2629 = vpow2.f32 %v1773_v48 }
 0x872   :  { %2631 = vpow2.f32 %v1775_v8 }
 0x874   :  { %v1759_v10 = vpop.xlane.xlu2 %1758 }
 0x875   :  { %v1769_v55 = vsub.f32 %v1707_v56, %v1759_v10 }
 0x877   :  { %v3565_v9 = vpop.eup %2629  ;;  %v1783_v16 = vmul.f32 1.442695, %v1769_v55 }
 0x878   :  { %v3567_v18 = vpop.eup %2631  ;;  %v1790_v24 = vsel %vm1738_vm14, %v3565_v9, 0.0 }
 0x879   :  { %1791 = vadd.xlane.f32.xlu2 %v1790_v24  ;;  %v1793_v22 = vsel %vm1738_vm14, %v3567_v18, 0.0  ;;  %2633 = vpow2.f32 %v1783_v16 }
 0x87a   :  { %1794 = vadd.xlane.f32.xlu0 %v1793_v22 }
 0x87f   :  { %v3573_v23 = vpop.eup %2633 }
 0x880   :  { %v1805_v26 = vsel %vm1738_vm14, %v3573_v23, 0.0 }
 0x881   :  { %1806 = vadd.xlane.f32.xlu2 %v1805_v26 }
 0x887   :  { %v1762_v5 = vpop.xlane.xlu0 %1761 }
 0x888   :  { %v1770_v13 = vsub.f32 %v1734_v59, %v1762_v5 }
 0x88a   :  { %v1785_v12 = vmul.f32 1.442695, %v1770_v13 }
 0x88c   :  { %2635 = vpow2.f32 %v1785_v12 }
 0x88e   :  { %1518 = vrot.lane.b32.xlu0 %v3431_v11, %s2663_s1 }
 0x88f   :  { %v1750_v14 = vpop.xlane.xlu0 %1749 }
 0x890   :  { %v1766_v17 = vsub.f32 %v1626_v33, %v1750_v14 }
 0x891   :  { %v1756_v28 = vpop.xlane.xlu1 %1755 }
 0x892   :  { %v3579_v30 = vpop.eup %2635  ;;  %v1777_v31 = vmul.f32 1.442695, %v1766_v17  ;;  %v1768_v32 = vsub.f32 %v1680_v19, %v1756_v28 }
 0x893   :  { %v1808_v34 = vsel %vm1738_vm14, %v3579_v30, 0.0 }
 0x894   :  { %2637 = vpow2.f32 %v1777_v31  ;;  %1809 = vadd.xlane.f32.xlu1 %v1808_v34  ;;  %v1781_v35 = vmul.f32 1.442695, %v1768_v32 }
 0x896   :  { %2639 = vpow2.f32 %v1781_v35 }
 0x897   :  { %v1753_v43 = vpop.xlane.xlu0 %1752  ;;  %2641 = vpow2.f32 %v1771_v47 }
 0x898   :  { %v1767_v49 = vsub.f32 %v3552_v63, %v1753_v43 }
 0x89a   :  { %v2638_v39 = vpop.eup %2637  ;;  %v1779_v57 = vmul.f32 1.442695, %v1767_v49 }
 0x89b   :  { %v1796_v40 = vsel %vm1738_vm14, %v2638_v39, 0.0 }
 0x89c   :  { %1797 = vadd.xlane.f32.xlu2 %v1796_v40  ;;  %v3584_v42 = vpop.eup %2639  ;;  %2643 = vpow2.f32 %v1779_v57 }
 0x89d   :  { %v1802_v44 = vsel %vm1738_vm14, %v3584_v42, 0.0  ;;  %v3591_v54 = vpop.eup %2641 }
 0x89e   :  { %v1787_v56 = vsel %vm1738_vm14, %v3591_v54, 0.0 }
 0x8a2   :  { %v3598_v58 = vpop.eup %2643 }
 0x8a4   :  { %1803 = vadd.xlane.f32.xlu2 %v1802_v44 }
 0x8a9   :  { %v1511_v46 = vpop.permute.xlu1 %1510 }
 0x8aa   :  { %v1995_v50 = vunpack.c.l.b16 %v1511_v46  ;;  %v1513_v52 = vpop.permute.xlu0 %1512 }
 0x8ab   :  { %v1996_v29 = vunpack.c.l.b16 %v1513_v52 }
 0x8ad   :  { %v1998_v51 = vpack.c.b16 %v1996_v29, %v1995_v50  ;;  %1506 = vrot.lane.b32.xlu1 %v3431_v11, %s2665_s14  ;;  %v1799_v11 = vsel %vm1738_vm14, %v3598_v58, 0.0 }
 0x8af   :  { %2014 = vmatpush.bf16.msra.mxu2 %v1998_v51 }
 0x8b2   :  { %v1517_v62 = vpop.permute.xlu0 %1516 }
 0x8b3   :  { %v2020_v15 = vunpack.c.l.b16 %v1517_v62 }
 0x8b8   :  { %1788 = vadd.xlane.f32.xlu0 %v1787_v56 }
 0x8bc   :  { %1504 = vrot.lane.b32.xlu2 %v3421_v36, %s2665_s14 }
 0x8e5   :  { %1800 = vadd.xlane.f32.xlu2 %v1799_v11 }
 0x8ec   :  { %v1792_v25 = vpop.xlane.xlu2 %1791 }
 0x8ed   :  { %v1812_v60 = vmax.f32 %v1792_v25, 1e-20  ;;  %v1795_v27 = vpop.xlane.xlu0 %1794 }
 0x8ee   :  { %v1813_v1 = vmax.f32 %v1795_v27, 1e-20 }
 0x8ef   :  { %2645 = vrcp.f32 %v1812_v60 }
 0x8f0   :  { %2647 = vrcp.f32 %v1813_v1  ;;  %v2536_v1 = vld [vmem:[%s3685_s7 + $0x1ec] sm:$0xf] }
 0x8f4   :  { %v1807_v33 = vpop.xlane.xlu2 %1806 }
 0x8f5   :  { %v2646_v61 = vpop.eup %2645  ;;  %v1817_v59 = vmax.f32 %v1807_v33, 1e-20  ;;  %v2532_v33 = vld [vmem:[%s3685_s7 + $0x1cc] sm:$0xf] }
 0x8f6   :  { %v2648_v36 = vpop.eup %2647  ;;  %v1828_v63 = vmul.f32 %v2646_v61, %v3565_v9  ;;  %v2467_v61 = vld [vmem:[%s3685_s7 + $0x1f8] sm:$0xf0] }
 0x8f7   :  { %v1829_v41 = vmul.f32 %v2648_v36, %v3567_v18  ;;  %2649 = vrcp.f32 %v1817_v59  ;;  %v2470_v36 = vor.u32 %v2536_v1, %v2467_v61  ;;  %v2459_v59 = vld [vmem:[%s3685_s7 + $0x1b8] sm:$0xf0] }
 0x8f8   :  { %v1836_v21 = vpack.c.bf16 %v1828_v63, %v1828_v63  ;;  %v2463_v63 = vld [vmem:[%s3685_s7 + $0x1d8] sm:$0xf0] }
 0x8f9   :  { %v1837_v0 = vpack.c.bf16 %v1829_v41, %v1829_v41  ;;  %v2466_v41 = vor.u32 %v2532_v33, %v2463_v63 }
 0x8fa   :  { %2432 = vmatmul.msk.bf16.vlgmr.msrb.gmra.mxu1 %vm1738_vm14, %v1836_v21  ;;  %v2528_v21 = vld [vmem:[%s3685_s7 + $0x1ac] sm:$0xf] }
 0x8fb   :  { %2433 = vmatmul.msk.bf16.vlgmr.msrb.gmra.mxu2 %vm1738_vm14, %v1837_v0 }
 0x8fd   :  { %v2650_v2 = vpop.eup %2649 }
 0x8fe   :  { %v1833_v3 = vmul.f32 %v2650_v2, %v3573_v23 }
 0x900   :  { %v1519_v53 = vpop.permute.xlu0 %1518  ;;  %v1841_v4 = vpack.c.bf16 %v1833_v3, %v1833_v3  ;;  %v2451_v3 = vld [vmem:[%s3685_s7 + $0x178] sm:$0xf0] }
 0x901   :  { %v2021_v19 = vunpack.c.l.b16 %v1519_v53  ;;  %v2462_v53 = vor.u32 %v2528_v21, %v2459_v59 }
 0x903   :  { %v2023_v20 = vpack.c.b16 %v2021_v19, %v2020_v15  ;;  %v2524_v15 = vld [vmem:[%s3685_s7 + $0x18c] sm:$0xf]  ;;  %v2455_v19 = vld [vmem:[%s3685_s7 + $0x198] sm:$0xf0] }
 0x904   :  { %v2458_v2 = vor.u32 %v2524_v15, %v2455_v19 }
 0x905   :  { %2039 = vmatpush.bf16.msra.mxu3 %v2023_v20  ;;  %v2520_v20 = vld [vmem:[%s3685_s7 + $0x16c] sm:$0xf] }
 0x907   :  { %v1810_v7 = vpop.xlane.xlu1 %1809 }
 0x908   :  { %v1818_v55 = vmax.f32 %v1810_v7, 1e-20 }
 0x90b   :  { %2437 = vmatmul.msk.bf16.vlgmr.msra.gmra.mxu2 %vm1738_vm14, %v1841_v4  ;;  %v2454_v4 = vor.u32 %v2520_v20, %v2451_v3 }
 0x90f   :  { %v1798_v6 = vpop.xlane.xlu2 %1797 }
 0x910   :  { %v1814_v38 = vmax.f32 %v1798_v6, 1e-20  ;;  %v2516_v6 = vld [vmem:[%s3685_s7 + $0x14c] sm:$0xf] }
 0x912   :  { %2651 = vrcp.f32 %v1814_v38  ;;  %v2447_v38 = vld [vmem:[%s3685_s7 + $0x158] sm:$0xf0] }
 0x913   :  { %v2450_v7 = vor.u32 %v2516_v6, %v2447_v38 }
 0x917   :  { %v1804_v37 = vpop.xlane.xlu2 %1803 }
 0x918   :  { %v2652_v48 = vpop.eup %2651  ;;  %v1816_v8 = vmax.f32 %v1804_v37, 1e-20  ;;  %v2512_v37 = vld [vmem:[%s3685_s7 + $0x12c] sm:$0xf] }
 0x919   :  { %v1830_v10 = vmul.f32 %v2652_v48, %v2638_v39  ;;  %v2443_v48 = vld [vmem:[%s3685_s7 + $0x138] sm:$0xf0] }
 0x91a   :  { %2653 = vrcp.f32 %v1816_v8  ;;  %v2446_v8 = vor.u32 %v2512_v37, %v2443_v48 }
 0x91b   :  { %v1838_v9 = vpack.c.bf16 %v1830_v10, %v1830_v10  ;;  %2655 = vrcp.f32 %v1818_v55  ;;  %v2508_v10 = vld [vmem:[%s3685_s7 + $0x10c] sm:$0xf]  ;;  %v2439_v55 = vld [vmem:[%s3685_s7 + $0x118] sm:$0xf0] }
 0x91d   :  { %2434 = vmatmul.msk.bf16.vlgmr.msrb.gmra.mxu3 %vm1738_vm14, %v1838_v9  ;;  %v2442_v9 = vor.u32 %v2508_v10, %v2439_v55 }
 0x91f   :  { %v1507_v18 = vpop.permute.xlu1 %1506  ;;  %v1505_v16 = vpop.permute.xlu2 %1504 }
 0x920   :  { %v2654_v24 = vpop.eup %2653  ;;  %v1971_v22 = vunpack.c.l.b16 %v1507_v18  ;;  %v1970_v23 = vunpack.c.l.b16 %v1505_v16 }
 0x921   :  { %v1832_v26 = vmul.f32 %v2654_v24, %v3584_v42  ;;  %v2656_v13 = vpop.eup %2655 }
 0x922   :  { %v1973_v5 = vpack.c.b16 %v1971_v22, %v1970_v23  ;;  %v1834_v14 = vmul.f32 %v2656_v13, %v3579_v30 }
 0x923   :  { %v1840_v12 = vpack.c.bf16 %v1832_v26, %v1832_v26 }
 0x924   :  { %1989 = vmatpush.bf16.msra.mxu1 %v1973_v5  ;;  %v1842_v17 = vpack.c.bf16 %v1834_v14, %v1834_v14 }
 0x927   :  { %2436 = vmatmul.msk.bf16.vlgmr.msra.gmra.mxu1 %vm1738_vm14, %v1840_v12 }
 0x92b   :  { %v1789_v28 = vpop.xlane.xlu0 %1788 }
 0x92c   :  { %v1811_v31 = vmax.f32 %v1789_v28, 1e-20 }
 0x92d   :  { %2438 = vmatmul.msk.bf16.vlgmr.msra.gmra.mxu3 %vm1738_vm14, %v1842_v17 }
 0x92e   :  { %2657 = vrcp.f32 %v1811_v31 }
 0x934   :  { %v2658_v32 = vpop.eup %2657 }
 0x935   :  { %v1827_v34 = vmul.f32 %v2658_v32, %v3591_v54 }
 0x937   :  { %v1835_v35 = vpack.c.bf16 %v1827_v34, %v1827_v34 }
 0x939   :  { %2431 = vmatmul.msk.bf16.vlgmr.msrb.gmra.mxu0 %vm1738_vm14, %v1835_v35 }
 0x93a   :  { %2109 = vmatpush.bf16.msrb.mxu0 %v2470_v36 }
 0x93e   :  { %2110 = vmatpush.bf16.msrb.mxu0 %v2466_v41 }
 0x942   :  { %2111 = vmatpush.bf16.msrb.mxu0 %v2462_v53 }
 0x946   :  { %2112 = vmatpush.bf16.msrb.mxu0 %v2458_v2 }
 0x94a   :  { %2113 = vmatpush.bf16.msrb.mxu0 %v2454_v4 }
 0x94e   :  { %2114 = vmatpush.bf16.msrb.mxu0 %v2450_v7 }
 0x952   :  { %2115 = vmatpush.bf16.msrb.mxu0 %v2446_v8 }
 0x956   :  { %2116 = vmatpush.bf16.msrb.mxu0 %v2442_v9 }
 0x958   :  { %v1801_v39 = vpop.xlane.xlu2 %1800 }
 0x959   :  { %v1815_v40 = vmax.f32 %v1801_v39, 1e-20 }
 0x95b   :  { %2659 = vrcp.f32 %v1815_v40  ;;  %v2661_v40 = vld [vmem:[%s3686_s8 + $0x8] sm:$0xff] }
 0x961   :  { %v2660_v42 = vpop.eup %2659 }
 0x962   :  { %v1831_v30 = vmul.f32 %v2660_v42, %v3598_v58  ;;  %v2076_v42 = vperm.slane %v2661_v40, 7 }
 0x964   :  { %v1839_v43 = vpack.c.bf16 %v1831_v30, %v1831_v30 }
 0x966   :  { %2435 = vmatmul.msk.bf16.vlgmr.msra.gmra.mxu0 %vm1738_vm14, %v1839_v43 }
 0x977   :  { %v1891_v44 = vpop.f32.mrf.mxu1 }
 0x97e   :  { %v1916_v45 = vpop.f32.mrf.mxu2 }
 0x97f   :  { %v1893_v46 = vpop.f32.mrf.mxu1 }
 0x986   :  { %v1918_v47 = vpop.f32.mrf.mxu2 }
 0x98e   :  { %v2016_v50 = vpop.f32.mrf.mxu2 }
 0x98f   :  { %v2559_v52 = vpack.i.bf16 %v2016_v50, %v1916_v45 }
 0x991   :  { %2560 = vrot.lane.b32.xlu1 %v2559_v52, %s2664_s2 }
 0x996   :  { %v2018_v29 = vpop.f32.mrf.mxu2 }
 0x9a0   :  { %v1941_v51 = vpop.f32.mrf.mxu3 }
 0x9a4   :  { %v1991_v54 = vpop.f32.mrf.mxu1 }
 0x9a5   :  { %v2564_v56 = vpack.i.bf16 %v1991_v54, %v1891_v44 }
 0x9a7   :  { %2565 = vrot.lane.b32.xlu1 %v2564_v56, %s2663_s1 }
 0x9a8   :  { %v1943_v49 = vpop.f32.mrf.mxu3 }
 0x9ac   :  { %v1993_v57 = vpop.f32.mrf.mxu1 }
 0x9b0   :  { %v2041_v58 = vpop.f32.mrf.mxu3 }
 0x9b1   :  { %v2569_v11 = vpack.i.bf16 %v2041_v58, %v1941_v51 }
 0x9b3   :  { %2570 = vrot.lane.b32.xlu1 %v2569_v11, %s2665_s14 }
 0x9b6   :  { %v1866_v62 = vpop.f32.mrf.mxu0 }
 0x9b8   :  { %v2043_v25 = vpop.f32.mrf.mxu3 }
 0x9be   :  { %v1868_v60 = vpop.f32.mrf.mxu0 }
 0x9e3   :  { %v1966_v27 = vpop.f32.mrf.mxu0 }
 0x9eb   :  { %v1968_v0 = vpop.f32.mrf.mxu0 }
 0xa03   :  { %v2561_v18 = vpop.permute.xlu1 %2560 }
 0xa04   :  { %v2563_v5 = vunpack.i.h.bf16 %v2561_v18  ;;  %v2562_v13 = vunpack.i.l.bf16 %v2561_v18 }
 0xa19   :  { %v2566_v16 = vpop.permute.xlu1 %2565 }
 0xa1a   :  { %v2568_v24 = vunpack.i.h.bf16 %v2566_v16  ;;  %v2567_v22 = vunpack.i.l.bf16 %v2566_v16 }
 0xa1c   :  { %v2057_v23 = vsel %vm466_vm9, %v1866_v62, %v2567_v22  ;;  %v2072_v26 = vsel %vm466_vm9, %v1966_v27, %v2568_v24 }
 0xa1d   :  { %v2058_v28 = vsel %vm75_vm1, %v2057_v23, %v2562_v13  ;;  %v2073_v31 = vsel %vm75_vm1, %v2072_v26, %v2563_v5 }
 0xa25   :  { %v2571_v12 = vpop.permute.xlu1 %2570 }
 0xa26   :  { %v2573_v14 = vunpack.i.h.bf16 %v2571_v12  ;;  %v2572_v17 = vunpack.i.l.bf16 %v2571_v12 }
 0xa28   :  { %v2059_v32 = vsel %vm891_vm13, %v2058_v28, %v2572_v17  ;;  %v2074_v34 = vsel %vm891_vm13, %v2073_v31, %v2573_v14 }
 0xa29   :  { %v2075_v35 = vpack.c.bf16 %v2074_v34, %v2059_v32 }
 0xa2b   :  { %2117 = vmatmul.bf16.vlgmr.msrb.gmra.mxu0 %v2075_v35 }
 0xaa8   :  { %v2118_v39 = vpop.f32.mrf.mxu0 }
 0xaa9   :  { %v2119_v44 = vadd.f32 %v2118_v39, %v2076_v42 }
 0xab0   :  { %v2120_v30 = vpop.f32.mrf.mxu0 }
 0xab1   :  { %v2121_v43 = vadd.f32 %v2120_v30, %v2076_v42 }
 0xab3   :  { %v2124_v45 = vrot.slane %v2121_v43, 7 }
 0xab5   :  { %v2126_v46 = vsel %vm108_vm8, %v2119_v44, %v2124_v45 }
 0xab6   :  { %2127 = vst [vmem:[%s3690_s9] sm:$0x3] %v2126_v46 }

</bundles_post_ra>
